<compile_context>
chip_gen: v7x
topology: tpu7x:2x2x1
jax: 0.10.0
libtpu: 0.0.40
codegen_flags: <defaults>
</compile_context>

<pallas_src>
import functools
import math

import jax
import jax.numpy as jnp
from jax.experimental import pallas as pl
from jax.experimental.pallas import tpu as pltpu


PARAM_ORDER = ('wq', 'bq', 'wk', 'bk', 'wv', 'bv', 'wo', 'bo',
               'g1', 'be1', 'w1', 'bf1', 'w2', 'bf2', 'g2', 'be2')


def _encoder_layer_kernel(*refs, n_heads, tq, eps, return_attn, kv_resident):
    x_ref = refs[0]
    (wq_ref, bq_ref, wk_ref, bk_ref, wv_ref, bv_ref, wo_ref, bo_ref,
     g1_ref, be1_ref, w1_ref, bf1_ref, w2_ref, bf2_ref, g2_ref, be2_ref) = refs[1:17]
    out_ref = refs[17]
    if return_attn:
        attn_ref = refs[18]
        ctx_scratch, k_scratch, v_scratch = refs[19:]
    else:
        attn_ref = None
        ctx_scratch, k_scratch, v_scratch = refs[18:]

    dtype = x_ref.dtype
    S = x_ref.shape[1]
    D = x_ref.shape[2]
    dk = D // n_heads
    scale = 1.0 / math.sqrt(dk)

    def linear_f32(v, w_ref, b_ref):
        # native-dtype operands, f32 MXU accumulation
        return (jnp.dot(v, w_ref[...], preferred_element_type=jnp.float32)
                + b_ref[...].astype(jnp.float32))

    def layernorm(y, g_ref, b_ref):           # y: f32 (rows, D)
        mu = jnp.mean(y, axis=-1, keepdims=True)
        var = jnp.mean(jnp.square(y - mu), axis=-1, keepdims=True)
        return ((y - mu) * jax.lax.rsqrt(var + eps)
                * g_ref[...].astype(jnp.float32)
                + b_ref[...].astype(jnp.float32))

    def project_kv():
        xkv = x_ref[0]                        # (S, D) full sequence, native dtype
        k_scratch[...] = linear_f32(xkv, wk_ref, bk_ref).astype(dtype)
        v_scratch[...] = linear_f32(xkv, wv_ref, bv_ref).astype(dtype)

    if kv_resident:
        # K/V scratch is filled once per batch element.  This is only correct
        # because the q grid axis is the innermost axis and is marked
        # "arbitrary" (sequential) -- do NOT flip it to "parallel" without
        # switching to the parallel_q / per-tile K/V path.
        @pl.when(pl.program_id(1) == 0)
        def _():
            project_kv()
    else:
        project_kv()                          # recomputed per q tile (parallel q)

    # ---- query tile sliced from the resident sequence block -------------------
    q_start = pl.multiple_of(pl.program_id(1) * tq, tq)
    xq = x_ref[0, pl.ds(q_start, tq), :]                     # (tq, D) native dtype

    # 1/sqrt(dk) folded into Q once (not per (tq, S) score block)
    q = (linear_f32(xq, wq_ref, bq_ref) * scale).astype(dtype)

    # ---- multi-head self attention on this query tile --------------------------
    # TODO(synk): for large n_heads (>=8) switch to lax.fori_loop over heads to
    # bound live ranges; static unroll kept so dk lane slices stay static.
    for h in range(n_heads):
        sl = slice(h * dk, (h + 1) * dk)      # static lane slice, no transpose
        q_h = q[:, sl]                        # (tq, dk)
        k_h = k_scratch[:, sl]                # (S,  dk)
        v_h = v_scratch[:, sl]                # (S,  dk)

        # scores = q_h @ k_h^T (contract dk on both operands), f32 accumulate
        s_h = jax.lax.dot_general(
            q_h, k_h, (((1,), (1,)), ((), ())),
            preferred_element_type=jnp.float32)              # (tq, S) f32

        # TODO(synk): attention mask path not implemented (mask=None case only).
        m = jnp.max(s_h, axis=-1, keepdims=True)
        p = jnp.exp(s_h - m)
        denom = jnp.sum(p, axis=-1, keepdims=True)
        inv = pl.reciprocal(denom, approx=True)              # EUP slot
        inv = inv * (2.0 - denom * inv)                      # Newton step -> ~f32
        a_h = p * inv                                        # (tq, S) f32
        # attention dropout (p=0.3) is identity at inference.

        if return_attn:
            attn_ref[0, h] = a_h.astype(attn_ref.dtype)

        # per-head context written directly into its lane slice (no concat)
        ctx_scratch[:, sl] = jnp.dot(
            a_h.astype(dtype), v_h,
            preferred_element_type=jnp.float32).astype(dtype)

    attn_out = linear_f32(ctx_scratch[...], wo_ref, bo_ref)

    # ---- sublayer connection 1 (residual + LayerNorm), f32 statistics ----------
    h1 = layernorm(attn_out + xq.astype(jnp.float32), g1_ref, be1_ref)

    # ---- position-wise feed forward ---------------------------------------------
    hid = jnp.maximum(linear_f32(h1.astype(dtype), w1_ref, bf1_ref), 0.0)
    ff = linear_f32(hid.astype(dtype), w2_ref, bf2_ref)

    # ---- sublayer connection 2 ---------------------------------------------------
    out = layernorm(ff + h1, g2_ref, be2_ref)
    out_ref[0] = out.astype(out_ref.dtype)


def _device_kind():
    try:
        return jax.devices()[0].device_kind.lower()
    except Exception:
        return ""


def _vmem_capacity_bytes():
    try:
        cap = getattr(pltpu.get_tpu_info(), "vmem_capacity_bytes", None)
        if cap:
            return int(cap)
    except Exception:
        pass
    return (64 if "v7" in _device_kind() else 128) * 1024 * 1024


def _pick_q_tile(S, max_tile):
    if S <= max_tile:
        return S
    # prefer multiples of 128: full MXU rows, unmasked out/attn stores
    t = (max_tile // 128) * 128
    while t >= 128:
        if S % t == 0:
            return t
        t -= 128
    for t in range(min(max_tile, S), 7, -8):
        if S % t == 0:
            return t
    return S  # TODO(synk): no ragged-tail handling for prime/odd S


def encoder_layer(x, params, n_heads, *, q_tile=None, return_attn=True,
                  attn_dtype=None, parallel_q=False, eps=1e-5,
                  single_buffer_weights=None):
    """Returns (out, attn) — attn is None when return_attn=False."""
    B, S, D = x.shape
    assert D % n_heads == 0

    cap = _vmem_capacity_bytes()
    kind = _device_kind()

    # v6e (128 MiB VMEM) can afford bigger q tiles; v5e / v7x stay at <=256.
    max_tile = 512 if ("v6" in kind and cap >= 128 * 1024 * 1024) else 256
    tq = q_tile if q_tile is not None else _pick_q_tile(S, max_tile)
    assert S % tq == 0, "ragged q tiles not supported"
    nq = S // tq

    # On v7x (64 MiB VMEM/TC) single-buffer the constant-index weight blocks so
    # double-buffered FFN weights cannot blow VMEM; elsewhere keep the default.
    if single_buffer_weights is None:
        single_buffer_weights = cap <= 96 * 1024 * 1024

    plist = [params[k] for k in PARAM_ORDER]

    def const_spec(shape):
        nd = len(shape)
        idx = lambda b, q, _nd=nd: (0,) * _nd
        if single_buffer_weights and hasattr(pl, "Buffered"):
            try:
                return pl.BlockSpec(shape, idx, pipeline_mode=pl.Buffered(1))
            except Exception:
                pass
        return pl.BlockSpec(shape, idx)

    # single x input: full-sequence block per batch element (query tile is
    # sliced out of it inside the kernel).
    in_specs = [pl.BlockSpec((1, S, D), lambda b, q: (b, 0, 0))]
    in_specs += [const_spec(p.shape) for p in plist]

    out_specs = [pl.BlockSpec((1, tq, D), lambda b, q: (b, q, 0))]
    out_shapes = [jax.ShapeDtypeStruct((B, S, D), x.dtype)]
    if return_attn:
        a_dt = x.dtype if attn_dtype is None else attn_dtype
        out_specs.append(pl.BlockSpec((1, n_heads, tq, S),
                                      lambda b, q: (b, 0, q, 0)))
        out_shapes.append(jax.ShapeDtypeStruct((B, n_heads, S, S), a_dt))

    scratch_shapes = [
        pltpu.VMEM((tq, D), x.dtype),   # context, assembled per head in place
        pltpu.VMEM((S, D), x.dtype),    # K projection
        pltpu.VMEM((S, D), x.dtype),    # V projection
    ]

    kv_resident = not parallel_q
    # B is always "parallel"; q must stay "arbitrary" while K/V scratch is only
    # filled at qi == 0.  parallel_q recomputes K/V per tile so both axes can
    # shard across TensorCores (v7x, small B).
    dim_sems = ("parallel", "arbitrary") if kv_resident else ("parallel", "parallel")

    vmem_limit = int(min(cap * 0.85, cap - 8 * 1024 * 1024))

    kernel = functools.partial(
        _encoder_layer_kernel, n_heads=n_heads, tq=tq, eps=eps,
        return_attn=return_attn, kv_resident=kv_resident)

    result = pl.pallas_call(
        kernel,
        out_shape=tuple(out_shapes) if return_attn else out_shapes[0],
        grid_spec=pltpu.PrefetchScalarGridSpec(
            num_scalar_prefetch=0,
            grid=(B, nq),
            in_specs=in_specs,
            out_specs=tuple(out_specs) if return_attn else out_specs[0],
            scratch_shapes=scratch_shapes,
        ),
        compiler_params=pltpu.CompilerParams(
            dimension_semantics=dim_sems,
            vmem_limit_bytes=vmem_limit,
        ),
    )(x, *plist)

    if return_attn:
        return result
    return result, None


def reference_encoder_layer(x, p, n_heads, eps=1e-5):
    """Pure-JAX reference (same math, no Pallas)."""
    B, S, D = x.shape
    dk = D // n_heads

    def lin(v, w, b):
        return v @ w + b

    def ln(y, g, b):
        mu = jnp.mean(y, axis=-1, keepdims=True)
        var = jnp.mean((y - mu) ** 2, axis=-1, keepdims=True)
        return (y - mu) / jnp.sqrt(var + eps) * g + b

    q = lin(x, p['wq'], p['bq']).reshape(B, S, n_heads, dk).transpose(0, 2, 1, 3)
    k = lin(x, p['wk'], p['bk']).reshape(B, S, n_heads, dk).transpose(0, 2, 1, 3)
    v = lin(x, p['wv'], p['bv']).reshape(B, S, n_heads, dk).transpose(0, 2, 1, 3)
    scores = jnp.einsum('bhqd,bhkd->bhqk', q, k) / jnp.sqrt(jnp.float32(dk))
    attn = jax.nn.softmax(scores, axis=-1)
    ctx = jnp.einsum('bhqk,bhkd->bhqd', attn, v).transpose(0, 2, 1, 3).reshape(B, S, D)
    attn_out = lin(ctx, p['wo'], p['bo'])
    h = ln(attn_out + x, p['g1'], p['be1'])
    ff = lin(jnp.maximum(lin(h, p['w1'], p['bf1']), 0.0), p['w2'], p['bf2'])
    out = ln(ff + h, p['g2'], p['be2'])
    return out, attn


def init_params(key, d_model, d_hidden):
    keys = jax.random.split(key, 6)
    s = 0.05
    return {
        'wq': jax.random.normal(keys[0], (d_model, d_model), jnp.float32) * s,
        'wk': jax.random.normal(keys[1], (d_model, d_model), jnp.float32) * s,
        'wv': jax.random.normal(keys[2], (d_model, d_model), jnp.float32) * s,
        'wo': jax.random.normal(keys[3], (d_model, d_model), jnp.float32) * s,
        'w1': jax.random.normal(keys[4], (d_model, d_hidden), jnp.float32) * s,
        'w2': jax.random.normal(keys[5], (d_hidden, d_model), jnp.float32) * s,
        'bq': jnp.zeros((1, d_model), jnp.float32),
        'bk': jnp.zeros((1, d_model), jnp.float32),
        'bv': jnp.zeros((1, d_model), jnp.float32),
        'bo': jnp.zeros((1, d_model), jnp.float32),
        'bf1': jnp.zeros((1, d_hidden), jnp.float32),
        'bf2': jnp.zeros((1, d_model), jnp.float32),
        # LayerNorm affine params (PyTorch init: weight=1, bias=0)
        'g1': jnp.ones((1, d_model), jnp.float32),
        'be1': jnp.zeros((1, d_model), jnp.float32),
        'g2': jnp.ones((1, d_model), jnp.float32),
        'be2': jnp.zeros((1, d_model), jnp.float32),
    }


if __name__ == "__main__":
    B, S, d_model, n_heads, d_hidden = 2, 8, 32, 4, 64

    key = jax.random.PRNGKey(0)
    kx, kp = jax.random.split(key)
    x = jax.random.normal(kx, (B, S, d_model), jnp.float32)
    params = init_params(kp, d_model, d_hidden)

    out_exp, attn_exp = reference_encoder_layer(x, params, n_heads)

    # f32 path with attention probabilities (module semantics)
    out, attn = encoder_layer(x, params, n_heads)
    jax.block_until_ready((out, attn))
    assert out.shape == (B, S, d_model)
    assert attn.shape == (B, n_heads, S, S)
    assert jnp.allclose(out, out_exp, atol=2e-3, rtol=2e-3)
    assert jnp.allclose(attn, attn_exp, atol=1e-3, rtol=1e-3)

    # fast path: skip the (B,H,S,S) attention output entirely
    out_only, attn_none = encoder_layer(x, params, n_heads, return_attn=False)
    jax.block_until_ready(out_only)
    assert attn_none is None
    assert jnp.allclose(out_only, out_exp, atol=2e-3, rtol=2e-3)

    # parallel-q variant (v7x 2-TC friendly when B is small): K/V per q tile
    out_pq, attn_pq = encoder_layer(x, params, n_heads, parallel_q=True)
    jax.block_until_ready((out_pq, attn_pq))
    assert jnp.allclose(out_pq, out_exp, atol=2e-3, rtol=2e-3)
    assert jnp.allclose(attn_pq, attn_exp, atol=1e-3, rtol=1e-3)

    # native bf16 path: bf16 operands and bf16 attention output (half the stores)
    xb = x.astype(jnp.bfloat16)
    pb = {k: v.astype(jnp.bfloat16) for k, v in params.items()}
    out_b, attn_b = encoder_layer(xb, pb, n_heads)
    jax.block_until_ready((out_b, attn_b))
    assert out_b.dtype == jnp.bfloat16
    assert attn_b.dtype == jnp.bfloat16
    assert jnp.allclose(out_b.astype(jnp.float32), out_exp, atol=0.3, rtol=0.2)
    assert jnp.allclose(attn_b.astype(jnp.float32), attn_exp, atol=0.1, rtol=0.1)

    print("KERNEL_OK")
</pallas_src>

<mosaic_0001>
module attributes {stable_mosaic.version = 11 : i64} {
  func.func @_encoder_layer_kernel(%arg0: i32, %arg1: i32, %arg2: memref<1x8x32xf32, #tpu.memory_space<vmem>>, %arg3: memref<32x32xf32, #tpu.memory_space<vmem>>, %arg4: memref<1x32xf32, #tpu.memory_space<vmem>>, %arg5: memref<32x32xf32, #tpu.memory_space<vmem>>, %arg6: memref<1x32xf32, #tpu.memory_space<vmem>>, %arg7: memref<32x32xf32, #tpu.memory_space<vmem>>, %arg8: memref<1x32xf32, #tpu.memory_space<vmem>>, %arg9: memref<32x32xf32, #tpu.memory_space<vmem>>, %arg10: memref<1x32xf32, #tpu.memory_space<vmem>>, %arg11: memref<1x32xf32, #tpu.memory_space<vmem>>, %arg12: memref<1x32xf32, #tpu.memory_space<vmem>>, %arg13: memref<32x64xf32, #tpu.memory_space<vmem>>, %arg14: memref<1x64xf32, #tpu.memory_space<vmem>>, %arg15: memref<64x32xf32, #tpu.memory_space<vmem>>, %arg16: memref<1x32xf32, #tpu.memory_space<vmem>>, %arg17: memref<1x32xf32, #tpu.memory_space<vmem>>, %arg18: memref<1x32xf32, #tpu.memory_space<vmem>>, %arg19: memref<1x8x32xf32, #tpu.memory_space<vmem>>, %arg20: memref<1x4x8x8xf32, #tpu.memory_space<vmem>>, %arg21: memref<8x32xf32, #tpu.memory_space<vmem>>, %arg22: memref<8x32xf32, #tpu.memory_space<vmem>>, %arg23: memref<8x32xf32, #tpu.memory_space<vmem>>) attributes {dimension_semantics = [#tpu.dimension_semantics<parallel>, #tpu.dimension_semantics<arbitrary>], iteration_bounds = array<i64: 2, 1>, scalar_prefetch = 0 : i64, scratch_operands = 3 : i64, tpu.core_type = #tpu.core_type<tc>, window_params = [{transform_indices = @transform_0, window_bounds = array<i64: 1, 8, 32>}, {pipeline_mode = #tpu.pipeline_mode<synchronous>, transform_indices = @transform_1, window_bounds = array<i64: 32, 32>}, {pipeline_mode = #tpu.pipeline_mode<synchronous>, transform_indices = @transform_2, window_bounds = array<i64: 1, 32>}, {pipeline_mode = #tpu.pipeline_mode<synchronous>, transform_indices = @transform_3, window_bounds = array<i64: 32, 32>}, {pipeline_mode = #tpu.pipeline_mode<synchronous>, transform_indices = @transform_4, window_bounds = array<i64: 1, 32>}, {pipeline_mode = #tpu.pipeline_mode<synchronous>, transform_indices = @transform_5, window_bounds = array<i64: 32, 32>}, {pipeline_mode = #tpu.pipeline_mode<synchronous>, transform_indices = @transform_6, window_bounds = array<i64: 1, 32>}, {pipeline_mode = #tpu.pipeline_mode<synchronous>, transform_indices = @transform_7, window_bounds = array<i64: 32, 32>}, {pipeline_mode = #tpu.pipeline_mode<synchronous>, transform_indices = @transform_8, window_bounds = array<i64: 1, 32>}, {pipeline_mode = #tpu.pipeline_mode<synchronous>, transform_indices = @transform_9, window_bounds = array<i64: 1, 32>}, {pipeline_mode = #tpu.pipeline_mode<synchronous>, transform_indices = @transform_10, window_bounds = array<i64: 1, 32>}, {pipeline_mode = #tpu.pipeline_mode<synchronous>, transform_indices = @transform_11, window_bounds = array<i64: 32, 64>}, {pipeline_mode = #tpu.pipeline_mode<synchronous>, transform_indices = @transform_12, window_bounds = array<i64: 1, 64>}, {pipeline_mode = #tpu.pipeline_mode<synchronous>, transform_indices = @transform_13, window_bounds = array<i64: 64, 32>}, {pipeline_mode = #tpu.pipeline_mode<synchronous>, transform_indices = @transform_14, window_bounds = array<i64: 1, 32>}, {pipeline_mode = #tpu.pipeline_mode<synchronous>, transform_indices = @transform_15, window_bounds = array<i64: 1, 32>}, {pipeline_mode = #tpu.pipeline_mode<synchronous>, transform_indices = @transform_16, window_bounds = array<i64: 1, 32>}, {transform_indices = @transform_17, window_bounds = array<i64: 1, 8, 32>}, {transform_indices = @transform_18, window_bounds = array<i64: 1, 4, 8, 8>}]} {
    %c0_i32 = arith.constant 0 : i32
    %0 = arith.cmpi eq, %arg1, %c0_i32 : i32
    %1 = arith.extui %0 : i1 to i32
    %c0_i32_0 = arith.constant 0 : i32
    %2 = arith.cmpi ne, %1, %c0_i32_0 : i32
    scf.if %2 {
      %c0_100 = arith.constant 0 : index
      %c0_101 = arith.constant 0 : index
      %c0_102 = arith.constant 0 : index
      %178 = vector.load %arg2[%c0_100, %c0_101, %c0_102] : memref<1x8x32xf32, #tpu.memory_space<vmem>>, vector<1x8x32xf32>
      %179 = vector.shape_cast %178 : vector<1x8x32xf32> to vector<8x32xf32>
      %c0_103 = arith.constant 0 : index
      %c0_104 = arith.constant 0 : index
      %180 = vector.load %arg5[%c0_103, %c0_104] : memref<32x32xf32, #tpu.memory_space<vmem>>, vector<32x32xf32>
      %cst_105 = arith.constant dense<0.000000e+00> : vector<8x32xf32>
      %181 = tpu.matmul %179, %180, %cst_105 {dimension_numbers = #tpu.dot_dimension_numbers<[1], [0], [0], [1], [0, 0, 1, 1], [], []>} : vector<8x32xf32>, vector<32x32xf32>, vector<8x32xf32> -> vector<8x32xf32>
      %c0_106 = arith.constant 0 : index
      %c0_107 = arith.constant 0 : index
      %182 = vector.load %arg6[%c0_106, %c0_107] : memref<1x32xf32, #tpu.memory_space<vmem>>, vector<1x32xf32>
      %183 = vector.broadcast %182 : vector<1x32xf32> to vector<8x32xf32>
      %184 = arith.addf %181, %183 : vector<8x32xf32>
      %c0_108 = arith.constant 0 : index
      %c0_109 = arith.constant 0 : index
      %185 = vector.load %arg22[%c0_108, %c0_109] : memref<8x32xf32, #tpu.memory_space<vmem>>, vector<8x32xf32>
      tpu.vector_store %arg22[%c0_108, %c0_109], %184 {strides = array<i32>} : memref<8x32xf32, #tpu.memory_space<vmem>>, vector<8x32xf32>,
      %c0_110 = arith.constant 0 : index
      %c0_111 = arith.constant 0 : index
      %186 = vector.load %arg7[%c0_110, %c0_111] : memref<32x32xf32, #tpu.memory_space<vmem>>, vector<32x32xf32>
      %cst_112 = arith.constant dense<0.000000e+00> : vector<8x32xf32>
      %187 = tpu.matmul %179, %186, %cst_112 {dimension_numbers = #tpu.dot_dimension_numbers<[1], [0], [0], [1], [0, 0, 1, 1], [], []>} : vector<8x32xf32>, vector<32x32xf32>, vector<8x32xf32> -> vector<8x32xf32>
      %c0_113 = arith.constant 0 : index
      %c0_114 = arith.constant 0 : index
      %188 = vector.load %arg8[%c0_113, %c0_114] : memref<1x32xf32, #tpu.memory_space<vmem>>, vector<1x32xf32>
      %189 = vector.broadcast %188 : vector<1x32xf32> to vector<8x32xf32>
      %190 = arith.addf %187, %189 : vector<8x32xf32>
      %c0_115 = arith.constant 0 : index
      %c0_116 = arith.constant 0 : index
      %191 = vector.load %arg23[%c0_115, %c0_116] : memref<8x32xf32, #tpu.memory_space<vmem>>, vector<8x32xf32>
      tpu.vector_store %arg23[%c0_115, %c0_116], %190 {strides = array<i32>} : memref<8x32xf32, #tpu.memory_space<vmem>>, vector<8x32xf32>,
    } else {
    }
    %c8_i32 = arith.constant 8 : i32
    %3 = arith.muli %arg1, %c8_i32 : i32
    %4 = tpu.assume_multiple %3, 8 : i32
    %c0 = arith.constant 0 : index
    %5 = arith.index_cast %4 : i32 to index
    %c0_1 = arith.constant 0 : index
    %6 = vector.load %arg2[%c0, %5, %c0_1] : memref<1x8x32xf32, #tpu.memory_space<vmem>>, vector<1x8x32xf32>
    %7 = vector.shape_cast %6 : vector<1x8x32xf32> to vector<8x32xf32>
    %c0_2 = arith.constant 0 : index
    %c0_3 = arith.constant 0 : index
    %8 = vector.load %arg3[%c0_2, %c0_3] : memref<32x32xf32, #tpu.memory_space<vmem>>, vector<32x32xf32>
    %cst = arith.constant dense<0.000000e+00> : vector<8x32xf32>
    %9 = tpu.matmul %7, %8, %cst {dimension_numbers = #tpu.dot_dimension_numbers<[1], [0], [0], [1], [0, 0, 1, 1], [], []>} : vector<8x32xf32>, vector<32x32xf32>, vector<8x32xf32> -> vector<8x32xf32>
    %c0_4 = arith.constant 0 : index
    %c0_5 = arith.constant 0 : index
    %10 = vector.load %arg4[%c0_4, %c0_5] : memref<1x32xf32, #tpu.memory_space<vmem>>, vector<1x32xf32>
    %11 = vector.broadcast %10 : vector<1x32xf32> to vector<8x32xf32>
    %12 = arith.addf %9, %11 : vector<8x32xf32>
    %cst_6 = arith.constant 0.353553385 : f32
    %13 = vector.broadcast %cst_6 : f32 to vector<8x32xf32>
    %14 = arith.mulf %12, %13 : vector<8x32xf32>
    %15 = vector.extract_strided_slice %14 {offsets = [0, 0], sizes = [8, 8], strides = [1, 1]} : vector<8x32xf32> to vector<8x8xf32>
    %c0_7 = arith.constant 0 : index
    %c0_8 = arith.constant 0 : index
    %16 = vector.load %arg22[%c0_7, %c0_8] : memref<8x32xf32, #tpu.memory_space<vmem>>, vector<8x8xf32>
    %c0_9 = arith.constant 0 : index
    %c0_10 = arith.constant 0 : index
    %17 = vector.load %arg23[%c0_9, %c0_10] : memref<8x32xf32, #tpu.memory_space<vmem>>, vector<8x8xf32>
    %cst_11 = arith.constant dense<0.000000e+00> : vector<8x8xf32>
    %18 = tpu.matmul %15, %16, %cst_11 {dimension_numbers = #tpu.dot_dimension_numbers<[1], [1], [0], [0], [0, 0, 1, 0], [], []>} : vector<8x8xf32>, vector<8x8xf32>, vector<8x8xf32> -> vector<8x8xf32>
    %cst_12 = arith.constant dense<0xFF800000> : vector<8xf32>
    %19 = vector.multi_reduction <maximumf>, %18, %cst_12 [1] : vector<8x8xf32> to vector<8xf32>
    %20 = vector.shape_cast %19 : vector<8xf32> to vector<8x1xf32>
    %21 = vector.broadcast %20 : vector<8x1xf32> to vector<8x8xf32>
    %22 = arith.subf %18, %21 : vector<8x8xf32>
    %23 = math.exp %22 : vector<8x8xf32>
    %cst_13 = arith.constant dense<0.000000e+00> : vector<8xf32>
    %24 = vector.multi_reduction <add>, %23, %cst_13 [1] : vector<8x8xf32> to vector<8xf32>
    %25 = vector.shape_cast %24 : vector<8xf32> to vector<8x1xf32>
    %26 = tpu.reciprocal %25 {approx = true} : vector<8x1xf32> -> vector<8x1xf32>
    %27 = arith.mulf %25, %26 : vector<8x1xf32>
    %cst_14 = arith.constant 2.000000e+00 : f32
    %28 = vector.broadcast %cst_14 : f32 to vector<8x1xf32>
    %29 = arith.subf %28, %27 : vector<8x1xf32>
    %30 = arith.mulf %26, %29 : vector<8x1xf32>
    %31 = vector.broadcast %30 : vector<8x1xf32> to vector<8x8xf32>
    %32 = arith.mulf %23, %31 : vector<8x8xf32>
    %c0_15 = arith.constant 0 : index
    %c0_16 = arith.constant 0 : index
    %c0_17 = arith.constant 0 : index
    %c0_18 = arith.constant 0 : index
    %33 = vector.load %arg20[%c0_15, %c0_16, %c0_17, %c0_18] : memref<1x4x8x8xf32, #tpu.memory_space<vmem>>, vector<1x1x8x8xf32>
    %34 = vector.shape_cast %33 : vector<1x1x8x8xf32> to vector<8x8xf32>
    %35 = vector.shape_cast %32 : vector<8x8xf32> to vector<1x1x8x8xf32>
    tpu.vector_store %arg20[%c0_15, %c0_16, %c0_17, %c0_18], %35 {strides = array<i32>} : memref<1x4x8x8xf32, #tpu.memory_space<vmem>>, vector<1x1x8x8xf32>,
    %cst_19 = arith.constant dense<0.000000e+00> : vector<8x8xf32>
    %36 = tpu.matmul %32, %17, %cst_19 {dimension_numbers = #tpu.dot_dimension_numbers<[1], [0], [0], [1], [0, 0, 1, 1], [], []>} : vector<8x8xf32>, vector<8x8xf32>, vector<8x8xf32> -> vector<8x8xf32>
    %c0_20 = arith.constant 0 : index
    %c0_21 = arith.constant 0 : index
    %37 = vector.load %arg21[%c0_20, %c0_21] : memref<8x32xf32, #tpu.memory_space<vmem>>, vector<8x8xf32>
    tpu.vector_store %arg21[%c0_20, %c0_21], %36 {strides = array<i32>} : memref<8x32xf32, #tpu.memory_space<vmem>>, vector<8x8xf32>,
    %38 = vector.extract_strided_slice %14 {offsets = [0, 8], sizes = [8, 8], strides = [1, 1]} : vector<8x32xf32> to vector<8x8xf32>
    %c0_22 = arith.constant 0 : index
    %c8 = arith.constant 8 : index
    %39 = vector.load %arg22[%c0_22, %c8] : memref<8x32xf32, #tpu.memory_space<vmem>>, vector<8x8xf32>
    %c0_23 = arith.constant 0 : index
    %c8_24 = arith.constant 8 : index
    %40 = vector.load %arg23[%c0_23, %c8_24] : memref<8x32xf32, #tpu.memory_space<vmem>>, vector<8x8xf32>
    %cst_25 = arith.constant dense<0.000000e+00> : vector<8x8xf32>
    %41 = tpu.matmul %38, %39, %cst_25 {dimension_numbers = #tpu.dot_dimension_numbers<[1], [1], [0], [0], [0, 0, 1, 0], [], []>} : vector<8x8xf32>, vector<8x8xf32>, vector<8x8xf32> -> vector<8x8xf32>
    %cst_26 = arith.constant dense<0xFF800000> : vector<8xf32>
    %42 = vector.multi_reduction <maximumf>, %41, %cst_26 [1] : vector<8x8xf32> to vector<8xf32>
    %43 = vector.shape_cast %42 : vector<8xf32> to vector<8x1xf32>
    %44 = vector.broadcast %43 : vector<8x1xf32> to vector<8x8xf32>
    %45 = arith.subf %41, %44 : vector<8x8xf32>
    %46 = math.exp %45 : vector<8x8xf32>
    %cst_27 = arith.constant dense<0.000000e+00> : vector<8xf32>
    %47 = vector.multi_reduction <add>, %46, %cst_27 [1] : vector<8x8xf32> to vector<8xf32>
    %48 = vector.shape_cast %47 : vector<8xf32> to vector<8x1xf32>
    %49 = tpu.reciprocal %48 {approx = true} : vector<8x1xf32> -> vector<8x1xf32>
    %50 = arith.mulf %48, %49 : vector<8x1xf32>
    %cst_28 = arith.constant 2.000000e+00 : f32
    %51 = vector.broadcast %cst_28 : f32 to vector<8x1xf32>
    %52 = arith.subf %51, %50 : vector<8x1xf32>
    %53 = arith.mulf %49, %52 : vector<8x1xf32>
    %54 = vector.broadcast %53 : vector<8x1xf32> to vector<8x8xf32>
    %55 = arith.mulf %46, %54 : vector<8x8xf32>
    %c0_29 = arith.constant 0 : index
    %c1 = arith.constant 1 : index
    %c0_30 = arith.constant 0 : index
    %c0_31 = arith.constant 0 : index
    %56 = vector.load %arg20[%c0_29, %c1, %c0_30, %c0_31] : memref<1x4x8x8xf32, #tpu.memory_space<vmem>>, vector<1x1x8x8xf32>
    %57 = vector.shape_cast %56 : vector<1x1x8x8xf32> to vector<8x8xf32>
    %58 = vector.shape_cast %55 : vector<8x8xf32> to vector<1x1x8x8xf32>
    tpu.vector_store %arg20[%c0_29, %c1, %c0_30, %c0_31], %58 {strides = array<i32>} : memref<1x4x8x8xf32, #tpu.memory_space<vmem>>, vector<1x1x8x8xf32>,
    %cst_32 = arith.constant dense<0.000000e+00> : vector<8x8xf32>
    %59 = tpu.matmul %55, %40, %cst_32 {dimension_numbers = #tpu.dot_dimension_numbers<[1], [0], [0], [1], [0, 0, 1, 1], [], []>} : vector<8x8xf32>, vector<8x8xf32>, vector<8x8xf32> -> vector<8x8xf32>
    %c0_33 = arith.constant 0 : index
    %c8_34 = arith.constant 8 : index
    %60 = vector.load %arg21[%c0_33, %c8_34] : memref<8x32xf32, #tpu.memory_space<vmem>>, vector<8x8xf32>
    tpu.vector_store %arg21[%c0_33, %c8_34], %59 {strides = array<i32>} : memref<8x32xf32, #tpu.memory_space<vmem>>, vector<8x8xf32>,
    %61 = vector.extract_strided_slice %14 {offsets = [0, 16], sizes = [8, 8], strides = [1, 1]} : vector<8x32xf32> to vector<8x8xf32>
    %c0_35 = arith.constant 0 : index
    %c16 = arith.constant 16 : index
    %62 = vector.load %arg22[%c0_35, %c16] : memref<8x32xf32, #tpu.memory_space<vmem>>, vector<8x8xf32>
    %c0_36 = arith.constant 0 : index
    %c16_37 = arith.constant 16 : index
    %63 = vector.load %arg23[%c0_36, %c16_37] : memref<8x32xf32, #tpu.memory_space<vmem>>, vector<8x8xf32>
    %cst_38 = arith.constant dense<0.000000e+00> : vector<8x8xf32>
    %64 = tpu.matmul %61, %62, %cst_38 {dimension_numbers = #tpu.dot_dimension_numbers<[1], [1], [0], [0], [0, 0, 1, 0], [], []>} : vector<8x8xf32>, vector<8x8xf32>, vector<8x8xf32> -> vector<8x8xf32>
    %cst_39 = arith.constant dense<0xFF800000> : vector<8xf32>
    %65 = vector.multi_reduction <maximumf>, %64, %cst_39 [1] : vector<8x8xf32> to vector<8xf32>
    %66 = vector.shape_cast %65 : vector<8xf32> to vector<8x1xf32>
    %67 = vector.broadcast %66 : vector<8x1xf32> to vector<8x8xf32>
    %68 = arith.subf %64, %67 : vector<8x8xf32>
    %69 = math.exp %68 : vector<8x8xf32>
    %cst_40 = arith.constant dense<0.000000e+00> : vector<8xf32>
    %70 = vector.multi_reduction <add>, %69, %cst_40 [1] : vector<8x8xf32> to vector<8xf32>
    %71 = vector.shape_cast %70 : vector<8xf32> to vector<8x1xf32>
    %72 = tpu.reciprocal %71 {approx = true} : vector<8x1xf32> -> vector<8x1xf32>
    %73 = arith.mulf %71, %72 : vector<8x1xf32>
    %cst_41 = arith.constant 2.000000e+00 : f32
    %74 = vector.broadcast %cst_41 : f32 to vector<8x1xf32>
    %75 = arith.subf %74, %73 : vector<8x1xf32>
    %76 = arith.mulf %72, %75 : vector<8x1xf32>
    %77 = vector.broadcast %76 : vector<8x1xf32> to vector<8x8xf32>
    %78 = arith.mulf %69, %77 : vector<8x8xf32>
    %c0_42 = arith.constant 0 : index
    %c2 = arith.constant 2 : index
    %c0_43 = arith.constant 0 : index
    %c0_44 = arith.constant 0 : index
    %79 = vector.load %arg20[%c0_42, %c2, %c0_43, %c0_44] : memref<1x4x8x8xf32, #tpu.memory_space<vmem>>, vector<1x1x8x8xf32>
    %80 = vector.shape_cast %79 : vector<1x1x8x8xf32> to vector<8x8xf32>
    %81 = vector.shape_cast %78 : vector<8x8xf32> to vector<1x1x8x8xf32>
    tpu.vector_store %arg20[%c0_42, %c2, %c0_43, %c0_44], %81 {strides = array<i32>} : memref<1x4x8x8xf32, #tpu.memory_space<vmem>>, vector<1x1x8x8xf32>,
    %cst_45 = arith.constant dense<0.000000e+00> : vector<8x8xf32>
    %82 = tpu.matmul %78, %63, %cst_45 {dimension_numbers = #tpu.dot_dimension_numbers<[1], [0], [0], [1], [0, 0, 1, 1], [], []>} : vector<8x8xf32>, vector<8x8xf32>, vector<8x8xf32> -> vector<8x8xf32>
    %c0_46 = arith.constant 0 : index
    %c16_47 = arith.constant 16 : index
    %83 = vector.load %arg21[%c0_46, %c16_47] : memref<8x32xf32, #tpu.memory_space<vmem>>, vector<8x8xf32>
    tpu.vector_store %arg21[%c0_46, %c16_47], %82 {strides = array<i32>} : memref<8x32xf32, #tpu.memory_space<vmem>>, vector<8x8xf32>,
    %84 = vector.extract_strided_slice %14 {offsets = [0, 24], sizes = [8, 8], strides = [1, 1]} : vector<8x32xf32> to vector<8x8xf32>
    %c0_48 = arith.constant 0 : index
    %c24 = arith.constant 24 : index
    %85 = vector.load %arg22[%c0_48, %c24] : memref<8x32xf32, #tpu.memory_space<vmem>>, vector<8x8xf32>
    %c0_49 = arith.constant 0 : index
    %c24_50 = arith.constant 24 : index
    %86 = vector.load %arg23[%c0_49, %c24_50] : memref<8x32xf32, #tpu.memory_space<vmem>>, vector<8x8xf32>
    %cst_51 = arith.constant dense<0.000000e+00> : vector<8x8xf32>
    %87 = tpu.matmul %84, %85, %cst_51 {dimension_numbers = #tpu.dot_dimension_numbers<[1], [1], [0], [0], [0, 0, 1, 0], [], []>} : vector<8x8xf32>, vector<8x8xf32>, vector<8x8xf32> -> vector<8x8xf32>
    %cst_52 = arith.constant dense<0xFF800000> : vector<8xf32>
    %88 = vector.multi_reduction <maximumf>, %87, %cst_52 [1] : vector<8x8xf32> to vector<8xf32>
    %89 = vector.shape_cast %88 : vector<8xf32> to vector<8x1xf32>
    %90 = vector.broadcast %89 : vector<8x1xf32> to vector<8x8xf32>
    %91 = arith.subf %87, %90 : vector<8x8xf32>
    %92 = math.exp %91 : vector<8x8xf32>
    %cst_53 = arith.constant dense<0.000000e+00> : vector<8xf32>
    %93 = vector.multi_reduction <add>, %92, %cst_53 [1] : vector<8x8xf32> to vector<8xf32>
    %94 = vector.shape_cast %93 : vector<8xf32> to vector<8x1xf32>
    %95 = tpu.reciprocal %94 {approx = true} : vector<8x1xf32> -> vector<8x1xf32>
    %96 = arith.mulf %94, %95 : vector<8x1xf32>
    %cst_54 = arith.constant 2.000000e+00 : f32
    %97 = vector.broadcast %cst_54 : f32 to vector<8x1xf32>
    %98 = arith.subf %97, %96 : vector<8x1xf32>
    %99 = arith.mulf %95, %98 : vector<8x1xf32>
    %100 = vector.broadcast %99 : vector<8x1xf32> to vector<8x8xf32>
    %101 = arith.mulf %92, %100 : vector<8x8xf32>
    %c0_55 = arith.constant 0 : index
    %c3 = arith.constant 3 : index
    %c0_56 = arith.constant 0 : index
    %c0_57 = arith.constant 0 : index
    %102 = vector.load %arg20[%c0_55, %c3, %c0_56, %c0_57] : memref<1x4x8x8xf32, #tpu.memory_space<vmem>>, vector<1x1x8x8xf32>
    %103 = vector.shape_cast %102 : vector<1x1x8x8xf32> to vector<8x8xf32>
    %104 = vector.shape_cast %101 : vector<8x8xf32> to vector<1x1x8x8xf32>
    tpu.vector_store %arg20[%c0_55, %c3, %c0_56, %c0_57], %104 {strides = array<i32>} : memref<1x4x8x8xf32, #tpu.memory_space<vmem>>, vector<1x1x8x8xf32>,
    %cst_58 = arith.constant dense<0.000000e+00> : vector<8x8xf32>
    %105 = tpu.matmul %101, %86, %cst_58 {dimension_numbers = #tpu.dot_dimension_numbers<[1], [0], [0], [1], [0, 0, 1, 1], [], []>} : vector<8x8xf32>, vector<8x8xf32>, vector<8x8xf32> -> vector<8x8xf32>
    %c0_59 = arith.constant 0 : index
    %c24_60 = arith.constant 24 : index
    %106 = vector.load %arg21[%c0_59, %c24_60] : memref<8x32xf32, #tpu.memory_space<vmem>>, vector<8x8xf32>
    tpu.vector_store %arg21[%c0_59, %c24_60], %105 {strides = array<i32>} : memref<8x32xf32, #tpu.memory_space<vmem>>, vector<8x8xf32>,
    %c0_61 = arith.constant 0 : index
    %c0_62 = arith.constant 0 : index
    %107 = vector.load %arg21[%c0_61, %c0_62] : memref<8x32xf32, #tpu.memory_space<vmem>>, vector<8x32xf32>
    %c0_63 = arith.constant 0 : index
    %c0_64 = arith.constant 0 : index
    %108 = vector.load %arg9[%c0_63, %c0_64] : memref<32x32xf32, #tpu.memory_space<vmem>>, vector<32x32xf32>
    %cst_65 = arith.constant dense<0.000000e+00> : vector<8x32xf32>
    %109 = tpu.matmul %107, %108, %cst_65 {dimension_numbers = #tpu.dot_dimension_numbers<[1], [0], [0], [1], [0, 0, 1, 1], [], []>} : vector<8x32xf32>, vector<32x32xf32>, vector<8x32xf32> -> vector<8x32xf32>
    %c0_66 = arith.constant 0 : index
    %c0_67 = arith.constant 0 : index
    %110 = vector.load %arg10[%c0_66, %c0_67] : memref<1x32xf32, #tpu.memory_space<vmem>>, vector<1x32xf32>
    %111 = vector.broadcast %110 : vector<1x32xf32> to vector<8x32xf32>
    %112 = arith.addf %109, %111 : vector<8x32xf32>
    %113 = arith.addf %112, %7 : vector<8x32xf32>
    %cst_68 = arith.constant dense<0.000000e+00> : vector<8xf32>
    %114 = vector.multi_reduction <add>, %113, %cst_68 [1] : vector<8x32xf32> to vector<8xf32>
    %115 = vector.shape_cast %114 : vector<8xf32> to vector<8x1xf32>
    %cst_69 = arith.constant 3.200000e+01 : f32
    %116 = vector.broadcast %cst_69 : f32 to vector<8x1xf32>
    %117 = arith.divf %115, %116 : vector<8x1xf32>
    %118 = vector.broadcast %117 : vector<8x1xf32> to vector<8x32xf32>
    %119 = arith.subf %113, %118 : vector<8x32xf32>
    %120 = arith.mulf %119, %119 : vector<8x32xf32>
    %cst_70 = arith.constant dense<0.000000e+00> : vector<8xf32>
    %121 = vector.multi_reduction <add>, %120, %cst_70 [1] : vector<8x32xf32> to vector<8xf32>
    %122 = vector.shape_cast %121 : vector<8xf32> to vector<8x1xf32>
    %cst_71 = arith.constant 3.200000e+01 : f32
    %123 = vector.broadcast %cst_71 : f32 to vector<8x1xf32>
    %124 = arith.divf %122, %123 : vector<8x1xf32>
    %125 = vector.broadcast %117 : vector<8x1xf32> to vector<8x32xf32>
    %126 = arith.subf %113, %125 : vector<8x32xf32>
    %cst_72 = arith.constant 9.99999974E-6 : f32
    %127 = vector.broadcast %cst_72 : f32 to vector<8x1xf32>
    %128 = arith.addf %124, %127 : vector<8x1xf32>
    %129 = math.rsqrt %128 : vector<8x1xf32>
    %130 = vector.broadcast %129 : vector<8x1xf32> to vector<8x32xf32>
    %131 = arith.mulf %126, %130 : vector<8x32xf32>
    %c0_73 = arith.constant 0 : index
    %c0_74 = arith.constant 0 : index
    %132 = vector.load %arg11[%c0_73, %c0_74] : memref<1x32xf32, #tpu.memory_space<vmem>>, vector<1x32xf32>
    %133 = vector.broadcast %132 : vector<1x32xf32> to vector<8x32xf32>
    %134 = arith.mulf %131, %133 : vector<8x32xf32>
    %c0_75 = arith.constant 0 : index
    %c0_76 = arith.constant 0 : index
    %135 = vector.load %arg12[%c0_75, %c0_76] : memref<1x32xf32, #tpu.memory_space<vmem>>, vector<1x32xf32>
    %136 = vector.broadcast %135 : vector<1x32xf32> to vector<8x32xf32>
    %137 = arith.addf %134, %136 : vector<8x32xf32>
    %c0_77 = arith.constant 0 : index
    %c0_78 = arith.constant 0 : index
    %138 = vector.load %arg13[%c0_77, %c0_78] : memref<32x64xf32, #tpu.memory_space<vmem>>, vector<32x64xf32>
    %cst_79 = arith.constant dense<0.000000e+00> : vector<8x64xf32>
    %139 = tpu.matmul %137, %138, %cst_79 {dimension_numbers = #tpu.dot_dimension_numbers<[1], [0], [0], [1], [0, 0, 1, 1], [], []>} : vector<8x32xf32>, vector<32x64xf32>, vector<8x64xf32> -> vector<8x64xf32>
    %c0_80 = arith.constant 0 : index
    %c0_81 = arith.constant 0 : index
    %140 = vector.load %arg14[%c0_80, %c0_81] : memref<1x64xf32, #tpu.memory_space<vmem>>, vector<1x64xf32>
    %141 = vector.broadcast %140 : vector<1x64xf32> to vector<8x64xf32>
    %142 = arith.addf %139, %141 : vector<8x64xf32>
    %cst_82 = arith.constant 0.000000e+00 : f32
    %143 = vector.broadcast %cst_82 : f32 to vector<8x64xf32>
    %144 = arith.maximumf %142, %143 : vector<8x64xf32>
    %c0_83 = arith.constant 0 : index
    %c0_84 = arith.constant 0 : index
    %145 = vector.load %arg15[%c0_83, %c0_84] : memref<64x32xf32, #tpu.memory_space<vmem>>, vector<64x32xf32>
    %cst_85 = arith.constant dense<0.000000e+00> : vector<8x32xf32>
    %146 = tpu.matmul %144, %145, %cst_85 {dimension_numbers = #tpu.dot_dimension_numbers<[1], [0], [0], [1], [0, 0, 1, 1], [], []>} : vector<8x64xf32>, vector<64x32xf32>, vector<8x32xf32> -> vector<8x32xf32>
    %c0_86 = arith.constant 0 : index
    %c0_87 = arith.constant 0 : index
    %147 = vector.load %arg16[%c0_86, %c0_87] : memref<1x32xf32, #tpu.memory_space<vmem>>, vector<1x32xf32>
    %148 = vector.broadcast %147 : vector<1x32xf32> to vector<8x32xf32>
    %149 = arith.addf %146, %148 : vector<8x32xf32>
    %150 = arith.addf %149, %137 : vector<8x32xf32>
    %cst_88 = arith.constant dense<0.000000e+00> : vector<8xf32>
    %151 = vector.multi_reduction <add>, %150, %cst_88 [1] : vector<8x32xf32> to vector<8xf32>
    %152 = vector.shape_cast %151 : vector<8xf32> to vector<8x1xf32>
    %cst_89 = arith.constant 3.200000e+01 : f32
    %153 = vector.broadcast %cst_89 : f32 to vector<8x1xf32>
    %154 = arith.divf %152, %153 : vector<8x1xf32>
    %155 = vector.broadcast %154 : vector<8x1xf32> to vector<8x32xf32>
    %156 = arith.subf %150, %155 : vector<8x32xf32>
    %157 = arith.mulf %156, %156 : vector<8x32xf32>
    %cst_90 = arith.constant dense<0.000000e+00> : vector<8xf32>
    %158 = vector.multi_reduction <add>, %157, %cst_90 [1] : vector<8x32xf32> to vector<8xf32>
    %159 = vector.shape_cast %158 : vector<8xf32> to vector<8x1xf32>
    %cst_91 = arith.constant 3.200000e+01 : f32
    %160 = vector.broadcast %cst_91 : f32 to vector<8x1xf32>
    %161 = arith.divf %159, %160 : vector<8x1xf32>
    %162 = vector.broadcast %154 : vector<8x1xf32> to vector<8x32xf32>
    %163 = arith.subf %150, %162 : vector<8x32xf32>
    %cst_92 = arith.constant 9.99999974E-6 : f32
    %164 = vector.broadcast %cst_92 : f32 to vector<8x1xf32>
    %165 = arith.addf %161, %164 : vector<8x1xf32>
    %166 = math.rsqrt %165 : vector<8x1xf32>
    %167 = vector.broadcast %166 : vector<8x1xf32> to vector<8x32xf32>
    %168 = arith.mulf %163, %167 : vector<8x32xf32>
    %c0_93 = arith.constant 0 : index
    %c0_94 = arith.constant 0 : index
    %169 = vector.load %arg17[%c0_93, %c0_94] : memref<1x32xf32, #tpu.memory_space<vmem>>, vector<1x32xf32>
    %170 = vector.broadcast %169 : vector<1x32xf32> to vector<8x32xf32>
    %171 = arith.mulf %168, %170 : vector<8x32xf32>
    %c0_95 = arith.constant 0 : index
    %c0_96 = arith.constant 0 : index
    %172 = vector.load %arg18[%c0_95, %c0_96] : memref<1x32xf32, #tpu.memory_space<vmem>>, vector<1x32xf32>
    %173 = vector.broadcast %172 : vector<1x32xf32> to vector<8x32xf32>
    %174 = arith.addf %171, %173 : vector<8x32xf32>
    %c0_97 = arith.constant 0 : index
    %c0_98 = arith.constant 0 : index
    %c0_99 = arith.constant 0 : index
    %175 = vector.load %arg19[%c0_97, %c0_98, %c0_99] : memref<1x8x32xf32, #tpu.memory_space<vmem>>, vector<1x8x32xf32>
    %176 = vector.shape_cast %175 : vector<1x8x32xf32> to vector<8x32xf32>
    %177 = vector.shape_cast %174 : vector<8x32xf32> to vector<1x8x32xf32>
    tpu.vector_store %arg19[%c0_97, %c0_98, %c0_99], %177 {strides = array<i32>} : memref<1x8x32xf32, #tpu.memory_space<vmem>>, vector<1x8x32xf32>,
    return
  }
  func.func @transform_0(%arg0: i32, %arg1: i32) -> (i32, i32, i32) {
    %c0_i32 = arith.constant 0 : i32
    %c0_i32_0 = arith.constant 0 : i32
    %c0_i32_1 = arith.constant 0 : i32
    return %arg0, %c0_i32, %c0_i32_0 : i32, i32, i32
  }
  func.func @transform_1(%arg0: i32, %arg1: i32) -> (i32, i32) {
    %c0_i32 = arith.constant 0 : i32
    %c0_i32_0 = arith.constant 0 : i32
    %c0_i32_1 = arith.constant 0 : i32
    return %c0_i32, %c0_i32_0 : i32, i32
  }
  func.func @transform_2(%arg0: i32, %arg1: i32) -> (i32, i32) {
    %c0_i32 = arith.constant 0 : i32
    %c0_i32_0 = arith.constant 0 : i32
    %c0_i32_1 = arith.constant 0 : i32
    return %c0_i32, %c0_i32_0 : i32, i32
  }
  func.func @transform_3(%arg0: i32, %arg1: i32) -> (i32, i32) {
    %c0_i32 = arith.constant 0 : i32
    %c0_i32_0 = arith.constant 0 : i32
    %c0_i32_1 = arith.constant 0 : i32
    return %c0_i32, %c0_i32_0 : i32, i32
  }
  func.func @transform_4(%arg0: i32, %arg1: i32) -> (i32, i32) {
    %c0_i32 = arith.constant 0 : i32
    %c0_i32_0 = arith.constant 0 : i32
    %c0_i32_1 = arith.constant 0 : i32
    return %c0_i32, %c0_i32_0 : i32, i32
  }
  func.func @transform_5(%arg0: i32, %arg1: i32) -> (i32, i32) {
    %c0_i32 = arith.constant 0 : i32
    %c0_i32_0 = arith.constant 0 : i32
    %c0_i32_1 = arith.constant 0 : i32
    return %c0_i32, %c0_i32_0 : i32, i32
  }
  func.func @transform_6(%arg0: i32, %arg1: i32) -> (i32, i32) {
    %c0_i32 = arith.constant 0 : i32
    %c0_i32_0 = arith.constant 0 : i32
    %c0_i32_1 = arith.constant 0 : i32
    return %c0_i32, %c0_i32_0 : i32, i32
  }
  func.func @transform_7(%arg0: i32, %arg1: i32) -> (i32, i32) {
    %c0_i32 = arith.constant 0 : i32
    %c0_i32_0 = arith.constant 0 : i32
    %c0_i32_1 = arith.constant 0 : i32
    return %c0_i32, %c0_i32_0 : i32, i32
  }
  func.func @transform_8(%arg0: i32, %arg1: i32) -> (i32, i32) {
    %c0_i32 = arith.constant 0 : i32
    %c0_i32_0 = arith.constant 0 : i32
    %c0_i32_1 = arith.constant 0 : i32
    return %c0_i32, %c0_i32_0 : i32, i32
  }
  func.func @transform_9(%arg0: i32, %arg1: i32) -> (i32, i32) {
    %c0_i32 = arith.constant 0 : i32
    %c0_i32_0 = arith.constant 0 : i32
    %c0_i32_1 = arith.constant 0 : i32
    return %c0_i32, %c0_i32_0 : i32, i32
  }
  func.func @transform_10(%arg0: i32, %arg1: i32) -> (i32, i32) {
    %c0_i32 = arith.constant 0 : i32
    %c0_i32_0 = arith.constant 0 : i32
    %c0_i32_1 = arith.constant 0 : i32
    return %c0_i32, %c0_i32_0 : i32, i32
  }
  func.func @transform_11(%arg0: i32, %arg1: i32) -> (i32, i32) {
    %c0_i32 = arith.constant 0 : i32
    %c0_i32_0 = arith.constant 0 : i32
    %c0_i32_1 = arith.constant 0 : i32
    return %c0_i32, %c0_i32_0 : i32, i32
  }
  func.func @transform_12(%arg0: i32, %arg1: i32) -> (i32, i32) {
    %c0_i32 = arith.constant 0 : i32
    %c0_i32_0 = arith.constant 0 : i32
    %c0_i32_1 = arith.constant 0 : i32
    return %c0_i32, %c0_i32_0 : i32, i32
  }
  func.func @transform_13(%arg0: i32, %arg1: i32) -> (i32, i32) {
    %c0_i32 = arith.constant 0 : i32
    %c0_i32_0 = arith.constant 0 : i32
    %c0_i32_1 = arith.constant 0 : i32
    return %c0_i32, %c0_i32_0 : i32, i32
  }
  func.func @transform_14(%arg0: i32, %arg1: i32) -> (i32, i32) {
    %c0_i32 = arith.constant 0 : i32
    %c0_i32_0 = arith.constant 0 : i32
    %c0_i32_1 = arith.constant 0 : i32
    return %c0_i32, %c0_i32_0 : i32, i32
  }
  func.func @transform_15(%arg0: i32, %arg1: i32) -> (i32, i32) {
    %c0_i32 = arith.constant 0 : i32
    %c0_i32_0 = arith.constant 0 : i32
    %c0_i32_1 = arith.constant 0 : i32
    return %c0_i32, %c0_i32_0 : i32, i32
  }
  func.func @transform_16(%arg0: i32, %arg1: i32) -> (i32, i32) {
    %c0_i32 = arith.constant 0 : i32
    %c0_i32_0 = arith.constant 0 : i32
    %c0_i32_1 = arith.constant 0 : i32
    return %c0_i32, %c0_i32_0 : i32, i32
  }
  func.func @transform_17(%arg0: i32, %arg1: i32) -> (i32, i32, i32) {
    %c0_i32 = arith.constant 0 : i32
    %c0_i32_0 = arith.constant 0 : i32
    return %arg0, %arg1, %c0_i32 : i32, i32, i32
  }
  func.func @transform_18(%arg0: i32, %arg1: i32) -> (i32, i32, i32, i32) {
    %c0_i32 = arith.constant 0 : i32
    %c0_i32_0 = arith.constant 0 : i32
    %c0_i32_1 = arith.constant 0 : i32
    return %arg0, %c0_i32, %arg1, %c0_i32_0 : i32, i32, i32, i32
  }
}

</mosaic_0001>

<bundles_post_ra>
// kernel: tpu_custom_call.1
= control target key start
LH: loop header
LB: loop body
LE: loop exit
PB: predicated region body
PF: predicated region fallthrough
CT: control target
= control target key end

     0   :  { %s4434_s0 = inlined_call_operand.hbm [shape: f32[2,8,32], index: 0, kind: input, shape index: {}]   ;;  %s4435_s1 = inlined_call_operand.hbm [shape: f32[32,32], index: 1, kind: input, shape index: {}]   ;;  %s4436_s2 = inlined_call_operand.hbm [shape: f32[1,32], index: 2, kind: input, shape index: {}]   ;;  %s4437_s3 = inlined_call_operand.hbm [shape: f32[32,32], index: 3, kind: input, shape index: {}]   ;;  %s4438_s4 = inlined_call_operand.hbm [shape: f32[1,32], index: 4, kind: input, shape index: {}]   ;;  %s4439_s5 = inlined_call_operand.hbm [shape: f32[32,32], index: 5, kind: input, shape index: {}]   ;;  %s4440_s6 = inlined_call_operand.hbm [shape: f32[1,32], index: 6, kind: input, shape index: {}]   ;;  %s4441_s7 = inlined_call_operand.hbm [shape: f32[32,32], index: 7, kind: input, shape index: {}]   ;;  %s4442_s8 = inlined_call_operand.hbm [shape: f32[1,32], index: 8, kind: input, shape index: {}]   ;;  %s4443_s9 = inlined_call_operand.hbm [shape: f32[1,32], index: 9, kind: input, shape index: {}]   ;;  %s4444_s10 = inlined_call_operand.hbm [shape: f32[1,32], index: 10, kind: input, shape index: {}]   ;;  %s4445_s11 = inlined_call_operand.hbm [shape: f32[32,64], index: 11, kind: input, shape index: {}]   ;;  %s4446_s12 = inlined_call_operand.hbm [shape: f32[1,64], index: 12, kind: input, shape index: {}]   ;;  %s4447_s13 = inlined_call_operand.hbm [shape: f32[64,32], index: 13, kind: input, shape index: {}]   ;;  %s4448_s14 = inlined_call_operand.hbm [shape: f32[1,32], index: 14, kind: input, shape index: {}]   ;;  %s4449_s15 = inlined_call_operand.hbm [shape: f32[1,32], index: 15, kind: input, shape index: {}]   ;;  %s4450_s16 = inlined_call_operand.hbm [shape: f32[1,32], index: 16, kind: input, shape index: {}]   ;;  %s4451_s17 = inlined_call_operand.hbm [shape: f32[2,8,32], index: 17, kind: output, shape index: {0}]   ;;  %s4452_s18 = inlined_call_operand.hbm [shape: f32[2,4,8,8], index: 18, kind: output, shape index: {1}]  }
   0x1   :  { %4475 = sst [smem:[#allocation54_spill]] %s4434_s0 }
   0x2   :  { %4476 = sst [smem:[#allocation55_spill]] %s4435_s1 }
   0x3   :  { %4477 = sst [smem:[#allocation56_spill]] %s4436_s2 }
   0x4   :  { %4478 = sst [smem:[#allocation57_spill]] %s4437_s3 }
   0x5   :  { %4479 = sst [smem:[#allocation58_spill]] %s4438_s4 }
   0x6   :  { %4480 = sst [smem:[#allocation59_spill]] %s4439_s5 }
   0x7   :  { %4481 = sst [smem:[#allocation60_spill]] %s4440_s6 }
   0x8   :  { %4482 = sst [smem:[#allocation61_spill]] %s4451_s17 }
   0x9   :  { %4483 = sst [smem:[#allocation62_spill]] %s4452_s18 }
   0xa   :  { %24 = vsyncpa [#allocation6], 0 }
   0xb   :  { %26 = vsyncpa [#allocation6 + $0x1], 0 }
   0xc   :  { %27 = vsyncpa [#allocation9], 0 }
   0xd   :  { %28 = vsyncpa [#allocation12], 0 }
   0xe   :  { %29 = vsyncpa [#allocation15], 0 }
   0xf   :  { %30 = vsyncpa [#allocation18], 0 }
  0x10   :  { %31 = vsyncpa [#allocation21], 0 }
  0x11   :  { %32 = vsyncpa [#allocation24], 0 }
  0x12   :  { %33 = vsyncpa [#allocation27], 0 }
  0x13   :  { %34 = vsyncpa [#allocation30], 0 }
  0x14   :  { %35 = vsyncpa [#allocation7], 0 }
  0x15   :  { %37 = vsyncpa [#allocation7 + $0x1], 0 }
  0x16   :  { %38 = vsyncpa [#allocation34], 0 }
  0x17   :  { %40 = vsyncpa [#allocation34 + $0x1], 0  ;;  %s3724_s27 = smov 0   ;;  %s3726_s28 = smov 0  }
  0x18   :  { %s3728_s29 = smov 0   ;;  %s3730_s30 = smov 0  }
  0x19   :  { %s3732_s0 = smov 0   ;;  %s3734_s19 = smov 0  }
  0x1a LB: > { %4484 = sst [smem:[#allocation46_spill]] %s3576_s27  ;;  %s4456_s1 = sadd.s32 4294967295, %s3596_s19   ;;  %s3596_s19 = sphi %s3734_s19, %s46_s19   ;;  %s3592_s0 = sphi %s3732_s0, %s4537_s0   ;;  %s3588_s30 = sphi %s3730_s30, %s4536_s30   ;;  %s3584_s29 = sphi %s3728_s29, %s4535_s29   ;;  %s3580_s28 = sphi %s3726_s28, %s4532_s28   ;;  %s3576_s27 = sphi %s3724_s27, %s4531_s27  }
  0x1b   : > { %4485 = sst [smem:[#allocation47_spill]] %s3580_s28  ;;  %p2427_p0 = scmp.ge.s32.totalorder %s3596_s19, 1 }
  0x1c   : > { %4486 = sst [smem:[#allocation48_spill]] %s3584_s29  ;;  %p3758_p1 = scmp.eq.s32.totalorder %s4456_s1, 0 }
  0x1d   : > { %4487 = sst [smem:[#allocation49_spill]] %s3588_s30  ;;  %p481_p2 = scmp.lt.s32.totalorder %s3596_s19, 3 }
  0x1e   : > { %4488 = sst [smem:[#allocation50_spill]] %s3592_s0  ;;  %s3598_s22 = smov [#allocation8]  }
  0x1f   : > { %4489 = sst [smem:[#allocation51_spill]] %s3596_s19  ;;  %p3763_p3 = pnand %p2427_p0, %p481_p2 }
  0x20   : > { %s4490_s20 = scalar_select %p3758_p1, 1, 0 }
  0x21   : > { %s4492_s21 = scalar_select %p3763_p3, 1, 0 }
  0x22   : > { %4491 = sst [smem:[#allocation52_spill]] %s4490_s20  ;;  %s493_s2 = sshll.u32 %s3598_s22, 4  ;;  %s3767_s2 = int_to_ptr.vmem [resolvable:$true] %s493_s2 }
  0x23   : > { %4493 = sst [smem:[#allocation53_spill]] %s4492_s21  ;;  %p2782_p4 = pneg %p3763_p3 }
  0x24   : > { %s3599_s24 = smov [#allocation11]   ;;  %s3600_s26 = smov [#allocation14]  }
  0x25   : > { %p3774_p6 = pnand %p2782_p4, %p3758_p1  ;;  %s517_s25 = sshll.u32 %s3599_s24, 4  ;;  %s3778_s25 = int_to_ptr.vmem [resolvable:$true] %s517_s25 }
  0x26   : > { %s3780_s1 = sshll.u32 %s3600_s26, 4  ;;  %s4495_s18 = sld [smem:[#allocation55_spill]]  ;;  %s542_s1 = int_to_ptr.vmem [resolvable:$true] %s3780_s1 }
  0x27   : > { %p3790_p8 = pneg %p3774_p6 }
  0x2c   : > { %s2972_s30 = scalar_lea.hbm %s4495_s18, 512 }
  0x2d   : > { %p2973_p7 = scmp.ne.s32.totalorder %s4495_s18, %s2972_s30  ;;  %p2979_p11 = scmp.lt.u32.totalorder %s2972_s30, %s4495_s18 }
  0x2f   : > { %p2975_p9 = pnand %p3790_p8, %p2973_p7 }
  0x31   : > { %p2976_p10 = pneg %p2975_p9 }
  0x33   : > { %p2981_p12 = pnand %p2979_p11, %p2976_p10 }
  0x35   : > { %2984 = shalt.err (!%p2981_p12)
}
  0x36   : > { %s2985_s17 = scalar_lea.vmem %s3767_s2, 512  ;;  %p2993_p4 = scmp.lt.s32.totalorder %s3767_s2, %s3767_s2 }
  0x37   : > { %p2986_p13 = scmp.ne.s32.totalorder %s3767_s2, %s2985_s17  ;;  %p2994_p5 = scmp.lt.s32.totalorder %s2985_s17, %s2985_s17 }
  0x39   : > { %p2988_p0 = pnand %p2986_p13, %p3790_p8  ;;  %p2995_p7 = por %p2994_p5, %p2993_p4 }
  0x3b   : > { %p2989_p2 = pneg %p2988_p0 }
  0x3d   : > { %p2996_p9 = pnand %p2995_p7, %p2989_p2 }
  0x3f   : > { %2999 = shalt.err (!%p2996_p9)
}
  0x40   : > { %s3601_s27 = smov 128   ;;  %s3602_s30 = smov 8  }
  0x41   : > { %2785 = dma.hbm_to_vmem [thread:$0]  (!%p3774_p6), %s4495_s18, 512, %s3767_s2, [#allocation9], %s3601_s27, %s3601_s27, %s3602_s30  }
  0x42   : > { %s4497_s3 = sld [smem:[#allocation57_spill]] }
  0x48   : > { %s3000_s17 = scalar_lea.hbm %s4497_s3, 512 }
  0x49   : > { %p3001_p5 = scmp.ne.s32.totalorder %s4497_s3, %s3000_s17  ;;  %p3007_p12 = scmp.lt.u32.totalorder %s3000_s17, %s4497_s3 }
  0x4b   : > { %p3003_p10 = pnand %p3001_p5, %p3790_p8 }
  0x4d   : > { %p3004_p11 = pneg %p3003_p10 }
  0x4f   : > { %p3009_p13 = pnand %p3007_p12, %p3004_p11 }
  0x51   : > { %3012 = shalt.err (!%p3009_p13)
}
  0x52   : > { %s3013_s2 = scalar_lea.vmem %s3778_s25, 512  ;;  %p3021_p7 = scmp.lt.s32.totalorder %s3778_s25, %s3778_s25 }
  0x53   : > { %p3014_p0 = scmp.ne.s32.totalorder %s3778_s25, %s3013_s2  ;;  %p3022_p9 = scmp.lt.s32.totalorder %s3013_s2, %s3013_s2 }
  0x55   : > { %p3016_p2 = pnand %p3014_p0, %p3790_p8  ;;  %p3023_p5 = por %p3022_p9, %p3021_p7 }
  0x57   : > { %p3017_p4 = pneg %p3016_p2 }
  0x59   : > { %p3024_p10 = pnand %p3023_p5, %p3017_p4 }
  0x5b   : > { %3027 = shalt.err (!%p3024_p10)
}
  0x5c   : > { %2791 = dma.hbm_to_vmem [thread:$0]  (!%p3774_p6), %s4497_s3, 512, %s3778_s25, [#allocation12], %s3601_s27, %s3601_s27, %s3602_s30  }
  0x5d   : > { %s4498_s5 = sld [smem:[#allocation59_spill]] }
  0x63   : > { %s3028_s21 = scalar_lea.hbm %s4498_s5, 512 }
  0x64   : > { %p3029_p11 = scmp.ne.s32.totalorder %s4498_s5, %s3028_s21  ;;  %p3035_p0 = scmp.lt.u32.totalorder %s3028_s21, %s4498_s5 }
  0x66   : > { %p3031_p12 = pnand %p3029_p11, %p3790_p8 }
  0x68   : > { %p3032_p13 = pneg %p3031_p12 }
  0x6a   : > { %p3037_p2 = pnand %p3035_p0, %p3032_p13 }
  0x6c   : > { %3040 = shalt.err (!%p3037_p2)
}
  0x6d   : > { %s3041_s2 = scalar_lea.vmem %s542_s1, 512  ;;  %p3049_p5 = scmp.lt.s32.totalorder %s542_s1, %s542_s1 }
  0x6e   : > { %p3042_p4 = scmp.ne.s32.totalorder %s542_s1, %s3041_s2  ;;  %p3050_p10 = scmp.lt.s32.totalorder %s3041_s2, %s3041_s2 }
  0x70   : > { %p3044_p7 = pnand %p3042_p4, %p3790_p8  ;;  %p3051_p3 = por %p3050_p10, %p3049_p5 }
  0x72   : > { %p3045_p9 = pneg %p3044_p7 }
  0x74   : > { %p3052_p1 = pnand %p3051_p3, %p3045_p9 }
  0x76   : > { %3055 = shalt.err (!%p3052_p1)
}
  0x77   : > { %2797 = dma.hbm_to_vmem [thread:$0]  (!%p3774_p6), %s4498_s5, 512, %s542_s1, [#allocation15], %s3601_s27, %s3601_s27, %s3602_s30  }
  0x78   : > { %s3603_s29 = smov [#allocation17]   ;;  %s3604_s19 = smov [#allocation20]  }
  0x79   : > { %s565_s0 = sshll.u32 %s3603_s29, 4  ;;  %s590_s21 = sshll.u32 %s3604_s19, 4  ;;  %s566_s0 = int_to_ptr.vmem [resolvable:$true] %s565_s0  ;;  %s591_s21 = int_to_ptr.vmem [resolvable:$true] %s590_s21 }
  0x7a   : > { %s3056_s26 = scalar_lea.hbm %s4441_s7, 512 }
  0x7b   : > { %p3057_p1 = scmp.ne.s32.totalorder %s4441_s7, %s3056_s26  ;;  %p3063_p12 = scmp.lt.u32.totalorder %s3056_s26, %s4441_s7 }
  0x7d   : > { %p3059_p3 = pnand %p3057_p1, %p3790_p8 }
  0x7f   : > { %p3060_p11 = pneg %p3059_p3 }
  0x81   : > { %p3065_p13 = pnand %p3063_p12, %p3060_p11 }
  0x83   : > { %3068 = shalt.err (!%p3065_p13)
}
  0x84   : > { %s3069_s1 = scalar_lea.vmem %s566_s0, 512  ;;  %p3077_p7 = scmp.lt.s32.totalorder %s566_s0, %s566_s0 }
  0x85   : > { %p3070_p0 = scmp.ne.s32.totalorder %s566_s0, %s3069_s1  ;;  %p3078_p9 = scmp.lt.s32.totalorder %s3069_s1, %s3069_s1 }
  0x87   : > { %p3072_p2 = pnand %p3070_p0, %p3790_p8  ;;  %p3079_p5 = por %p3078_p9, %p3077_p7 }
  0x89   : > { %p3073_p4 = pneg %p3072_p2 }
  0x8b   : > { %p3080_p10 = pnand %p3079_p5, %p3073_p4 }
  0x8d   : > { %3083 = shalt.err (!%p3080_p10)
}
  0x8e   : > { %2803 = dma.hbm_to_vmem [thread:$0]  (!%p3774_p6), %s4441_s7, 512, %s566_s0, [#allocation18], %s3601_s27, %s3601_s27, %s3602_s30  }
  0x8f   : > { %s3084_s22 = scalar_lea.hbm %s4443_s9, 16 }
  0x90   : > { %p3085_p1 = scmp.ne.s32.totalorder %s4443_s9, %s3084_s22  ;;  %p3091_p12 = scmp.lt.u32.totalorder %s3084_s22, %s4443_s9 }
  0x92   : > { %p3087_p3 = pnand %p3085_p1, %p3790_p8 }
  0x94   : > { %p3088_p11 = pneg %p3087_p3 }
  0x96   : > { %p3093_p13 = pnand %p3091_p12, %p3088_p11 }
  0x98   : > { %3096 = shalt.err (!%p3093_p13)
}
  0x99   : > { %s3097_s25 = scalar_lea.vmem %s591_s21, 16  ;;  %s3104_s0 = scalar_lea.vmem %s591_s21, 32 }
  0x9a   : > { %p3098_p0 = scmp.ne.s32.totalorder %s591_s21, %s3097_s25  ;;  %p3105_p7 = scmp.lt.s32.totalorder %s591_s21, %s591_s21 }
  0x9b   : > { %p3106_p9 = scmp.lt.s32.totalorder %s3104_s0, %s3097_s25 }
  0x9c   : > { %p3100_p2 = pnand %p3098_p0, %p3790_p8 }
  0x9d   : > { %p3107_p5 = por %p3106_p9, %p3105_p7 }
  0x9e   : > { %p3101_p4 = pneg %p3100_p2 }
  0xa0   : > { %p3108_p10 = pnand %p3107_p5, %p3101_p4 }
  0xa2   : > { %3111 = shalt.err (!%p3108_p10)
}
  0xa3   : > { %2809 = dma.hbm_to_vmem [thread:$0]  (!%p3774_p6), %s4443_s9, 16, %s591_s21, [#allocation21]  }
  0xa4   : > { %s3605_s28 = smov [#allocation23]   ;;  %s3606_s19 = smov [#allocation26]  }
  0xa5   : > { %s611_s29 = sshll.u32 %s3605_s28, 4  ;;  %s635_s22 = sshll.u32 %s3606_s19, 4  ;;  %s612_s29 = int_to_ptr.vmem [resolvable:$true] %s611_s29  ;;  %s636_s22 = int_to_ptr.vmem [resolvable:$true] %s635_s22 }
  0xa6   : > { %s3112_s17 = scalar_lea.hbm %s4445_s11, 512 }
  0xa7   : > { %p3113_p1 = scmp.ne.s32.totalorder %s4445_s11, %s3112_s17  ;;  %p3119_p12 = scmp.lt.u32.totalorder %s3112_s17, %s4445_s11 }
  0xa9   : > { %p3115_p3 = pnand %p3113_p1, %p3790_p8 }
  0xab   : > { %p3116_p11 = pneg %p3115_p3 }
  0xad   : > { %p3121_p13 = pnand %p3119_p12, %p3116_p11 }
  0xaf   : > { %3124 = shalt.err (!%p3121_p13)
}
  0xb0   : > { %s3125_s21 = scalar_lea.vmem %s612_s29, 512  ;;  %p3133_p7 = scmp.lt.s32.totalorder %s612_s29, %s612_s29 }
  0xb1   : > { %p3126_p0 = scmp.ne.s32.totalorder %s612_s29, %s3125_s21  ;;  %p3134_p9 = scmp.lt.s32.totalorder %s3125_s21, %s3125_s21 }
  0xb3   : > { %p3128_p2 = pnand %p3126_p0, %p3790_p8  ;;  %p3135_p5 = por %p3134_p9, %p3133_p7 }
  0xb5   : > { %p3129_p4 = pneg %p3128_p2 }
  0xb7   : > { %p3136_p10 = pnand %p3135_p5, %p3129_p4 }
  0xb9   : > { %3139 = shalt.err (!%p3136_p10)
}
  0xba   : > { %2815 = dma.hbm_to_vmem [thread:$0]  (!%p3774_p6), %s4445_s11, 512, %s612_s29, [#allocation24], %s3601_s27, %s3601_s27, %s3602_s30  }
  0xbb   : > { %s3140_s26 = scalar_lea.hbm %s4447_s13, 1024 }
  0xbc   : > { %p3141_p1 = scmp.ne.s32.totalorder %s4447_s13, %s3140_s26  ;;  %p3147_p12 = scmp.lt.u32.totalorder %s3140_s26, %s4447_s13 }
  0xbe   : > { %p3143_p3 = pnand %p3141_p1, %p3790_p8 }
  0xc0   : > { %p3144_p11 = pneg %p3143_p3 }
  0xc2   : > { %p3149_p13 = pnand %p3147_p12, %p3144_p11 }
  0xc4   : > { %3152 = shalt.err (!%p3149_p13)
}
  0xc5   : > { %s3153_s1 = scalar_lea.vmem %s636_s22, 1024  ;;  %p3161_p7 = scmp.lt.s32.totalorder %s636_s22, %s636_s22 }
  0xc6   : > { %p3154_p0 = scmp.ne.s32.totalorder %s636_s22, %s3153_s1  ;;  %p3162_p9 = scmp.lt.s32.totalorder %s3153_s1, %s3153_s1 }
  0xc8   : > { %p3156_p2 = pnand %p3154_p0, %p3790_p8  ;;  %p3163_p5 = por %p3162_p9, %p3161_p7 }
  0xca   : > { %p3157_p4 = pneg %p3156_p2 }
  0xcc   : > { %p3164_p10 = pnand %p3163_p5, %p3157_p4 }
  0xce   : > { %3167 = shalt.err (!%p3164_p10)
}
  0xcf   : > { %2821 = dma.hbm_to_vmem [thread:$0]  (!%p3774_p6), %s4447_s13, 1024, %s636_s22, [#allocation27], %s3601_s27, %s3601_s27, %s3602_s30  }
  0xd0   : > { %s3607_s3 = smov [#allocation29]   ;;  %s3608_s19 = smov [#allocation10]  }
  0xd1   : > { %s660_s28 = sshll.u32 %s3607_s3, 4  ;;  %s507_s24 = sshll.u32 %s3608_s19, 4  ;;  %s661_s28 = int_to_ptr.vmem [resolvable:$true] %s660_s28  ;;  %s508_s24 = int_to_ptr.vmem [resolvable:$true] %s507_s24 }
  0xd2   : > { %s3168_s2 = scalar_lea.hbm %s4449_s15, 16 }
  0xd3   : > { %p3169_p1 = scmp.ne.s32.totalorder %s4449_s15, %s3168_s2  ;;  %p3175_p12 = scmp.lt.u32.totalorder %s3168_s2, %s4449_s15 }
  0xd5   : > { %p3171_p3 = pnand %p3169_p1, %p3790_p8 }
  0xd7   : > { %p3172_p11 = pneg %p3171_p3 }
  0xd9   : > { %p3177_p13 = pnand %p3175_p12, %p3172_p11 }
  0xdb   : > { %3180 = shalt.err (!%p3177_p13)
}
  0xdc   : > { %s3181_s27 = scalar_lea.vmem %s661_s28, 16  ;;  %s3188_s30 = scalar_lea.vmem %s661_s28, 32 }
  0xdd   : > { %p3182_p0 = scmp.ne.s32.totalorder %s661_s28, %s3181_s27  ;;  %p3189_p7 = scmp.lt.s32.totalorder %s661_s28, %s661_s28 }
  0xde   : > { %p3190_p9 = scmp.lt.s32.totalorder %s3188_s30, %s3181_s27 }
  0xdf   : > { %p3184_p2 = pnand %p3182_p0, %p3790_p8 }
  0xe0   : > { %p3191_p5 = por %p3190_p9, %p3189_p7 }
  0xe1   : > { %p3185_p4 = pneg %p3184_p2 }
  0xe3   : > { %p3192_p10 = pnand %p3191_p5, %p3185_p4 }
  0xe5   : > { %3195 = shalt.err (!%p3192_p10)
}
  0xe6   : > { %2827 = dma.hbm_to_vmem [thread:$0]  (!%p3774_p6), %s4449_s15, 16, %s661_s28, [#allocation30]  }
  0xe7   : > { %s4499_s26 = sld [smem:[#allocation56_spill]] }
  0xed   : > { %s3196_s17 = scalar_lea.hbm %s4499_s26, 16 }
  0xee   : > { %p3197_p1 = scmp.ne.s32.totalorder %s4499_s26, %s3196_s17  ;;  %p3203_p12 = scmp.lt.u32.totalorder %s3196_s17, %s4499_s26 }
  0xf0   : > { %p3199_p3 = pnand %p3197_p1, %p3790_p8 }
  0xf2   : > { %p3200_p11 = pneg %p3199_p3 }
  0xf4   : > { %p3205_p13 = pnand %p3203_p12, %p3200_p11 }
  0xf6   : > { %3208 = shalt.err (!%p3205_p13)
}
  0xf7   : > { %s3209_s29 = scalar_lea.vmem %s508_s24, 16  ;;  %s3216_s28 = scalar_lea.vmem %s508_s24, 32 }
  0xf8   : > { %p3210_p0 = scmp.ne.s32.totalorder %s508_s24, %s3209_s29  ;;  %p3217_p7 = scmp.lt.s32.totalorder %s508_s24, %s508_s24 }
  0xf9   : > { %p3218_p9 = scmp.lt.s32.totalorder %s3216_s28, %s3209_s29 }
  0xfa   : > { %p3212_p2 = pnand %p3210_p0, %p3790_p8 }
  0xfb   : > { %p3219_p5 = por %p3218_p9, %p3217_p7 }
  0xfc   : > { %p3213_p4 = pneg %p3212_p2 }
  0xfe   : > { %p3220_p10 = pnand %p3219_p5, %p3213_p4 }
 0x100   : > { %3223 = shalt.err (!%p3220_p10)
}
 0x101   : > { %2788 = dma.hbm_to_vmem [thread:$0]  (!%p3774_p6), %s4499_s26, 16, %s508_s24, [#allocation9]  }
 0x102   : > { %s3609_s22 = smov [#allocation13]   ;;  %s3610_s3 = smov [#allocation16]  }
 0x103   : > { %s531_s21 = sshll.u32 %s3609_s22, 4  ;;  %s555_s19 = sshll.u32 %s3610_s3, 4  ;;  %s532_s21 = int_to_ptr.vmem [resolvable:$true] %s531_s21  ;;  %s556_s19 = int_to_ptr.vmem [resolvable:$true] %s555_s19 }
 0x104   : > { %s4500_s4 = sld [smem:[#allocation58_spill]] }
 0x10a   : > { %s3224_s25 = scalar_lea.hbm %s4500_s4, 16 }
 0x10b   : > { %p3225_p1 = scmp.ne.s32.totalorder %s4500_s4, %s3224_s25  ;;  %p3231_p12 = scmp.lt.u32.totalorder %s3224_s25, %s4500_s4 }
 0x10d   : > { %p3227_p3 = pnand %p3225_p1, %p3790_p8 }
 0x10f   : > { %p3228_p11 = pneg %p3227_p3 }
 0x111   : > { %p3233_p13 = pnand %p3231_p12, %p3228_p11 }
 0x113   : > { %3236 = shalt.err (!%p3233_p13)
}
 0x114   : > { %s3237_s24 = scalar_lea.vmem %s532_s21, 16  ;;  %s3244_s27 = scalar_lea.vmem %s532_s21, 32 }
 0x115   : > { %p3238_p0 = scmp.ne.s32.totalorder %s532_s21, %s3237_s24  ;;  %p3245_p7 = scmp.lt.s32.totalorder %s532_s21, %s532_s21 }
 0x116   : > { %p3246_p9 = scmp.lt.s32.totalorder %s3244_s27, %s3237_s24 }
 0x117   : > { %p3240_p2 = pnand %p3238_p0, %p3790_p8 }
 0x118   : > { %p3247_p5 = por %p3246_p9, %p3245_p7 }
 0x119   : > { %p3241_p4 = pneg %p3240_p2 }
 0x11b   : > { %p3248_p10 = pnand %p3247_p5, %p3241_p4 }
 0x11d   : > { %3251 = shalt.err (!%p3248_p10)
}
 0x11e   : > { %2794 = dma.hbm_to_vmem [thread:$0]  (!%p3774_p6), %s4500_s4, 16, %s532_s21, [#allocation12]  }
 0x11f   : > { %s4501_s6 = sld [smem:[#allocation60_spill]] }
 0x125   : > { %s3252_s2 = scalar_lea.hbm %s4501_s6, 16 }
 0x126   : > { %p3253_p1 = scmp.ne.s32.totalorder %s4501_s6, %s3252_s2  ;;  %p3259_p12 = scmp.lt.u32.totalorder %s3252_s2, %s4501_s6 }
 0x128   : > { %p3255_p3 = pnand %p3253_p1, %p3790_p8 }
 0x12a   : > { %p3256_p11 = pneg %p3255_p3 }
 0x12c   : > { %p3261_p13 = pnand %p3259_p12, %p3256_p11 }
 0x12e   : > { %3264 = shalt.err (!%p3261_p13)
}
 0x12f   : > { %s3265_s28 = scalar_lea.vmem %s556_s19, 16  ;;  %s3272_s21 = scalar_lea.vmem %s556_s19, 32 }
 0x130   : > { %p3266_p0 = scmp.ne.s32.totalorder %s556_s19, %s3265_s28  ;;  %p3273_p7 = scmp.lt.s32.totalorder %s556_s19, %s556_s19 }
 0x131   : > { %p3274_p9 = scmp.lt.s32.totalorder %s3272_s21, %s3265_s28 }
 0x132   : > { %p3268_p2 = pnand %p3266_p0, %p3790_p8 }
 0x133   : > { %p3275_p5 = por %p3274_p9, %p3273_p7 }
 0x134   : > { %p3269_p4 = pneg %p3268_p2 }
 0x136   : > { %p3276_p10 = pnand %p3275_p5, %p3269_p4 }
 0x138   : > { %3279 = shalt.err (!%p3276_p10)
}
 0x139   : > { %2800 = dma.hbm_to_vmem [thread:$0]  (!%p3774_p6), %s4501_s6, 16, %s556_s19, [#allocation15]  }
 0x13a   : > { %s3611_s30 = smov [#allocation19]   ;;  %s3612_s3 = smov [#allocation22]  }
 0x13b   : > { %s579_s22 = sshll.u32 %s3611_s30, 4  ;;  %s601_s17 = sshll.u32 %s3612_s3, 4  ;;  %s580_s22 = int_to_ptr.vmem [resolvable:$true] %s579_s22  ;;  %s602_s17 = int_to_ptr.vmem [resolvable:$true] %s601_s17 }
 0x13c   : > { %s3280_s0 = scalar_lea.hbm %s4442_s8, 16 }
 0x13d   : > { %p3281_p1 = scmp.ne.s32.totalorder %s4442_s8, %s3280_s0  ;;  %p3287_p12 = scmp.lt.u32.totalorder %s3280_s0, %s4442_s8 }
 0x13f   : > { %p3283_p3 = pnand %p3281_p1, %p3790_p8 }
 0x141   : > { %p3284_p11 = pneg %p3283_p3 }
 0x143   : > { %p3289_p13 = pnand %p3287_p12, %p3284_p11 }
 0x145   : > { %3292 = shalt.err (!%p3289_p13)
}
 0x146   : > { %s3293_s19 = scalar_lea.vmem %s580_s22, 16  ;;  %s3300_s24 = scalar_lea.vmem %s580_s22, 32 }
 0x147   : > { %p3294_p0 = scmp.ne.s32.totalorder %s580_s22, %s3293_s19  ;;  %p3301_p7 = scmp.lt.s32.totalorder %s580_s22, %s580_s22 }
 0x148   : > { %p3302_p9 = scmp.lt.s32.totalorder %s3300_s24, %s3293_s19 }
 0x149   : > { %p3296_p2 = pnand %p3294_p0, %p3790_p8 }
 0x14a   : > { %p3303_p5 = por %p3302_p9, %p3301_p7 }
 0x14b   : > { %p3297_p4 = pneg %p3296_p2 }
 0x14d   : > { %p3304_p10 = pnand %p3303_p5, %p3297_p4 }
 0x14f   : > { %3307 = shalt.err (!%p3304_p10)
}
 0x150   : > { %2806 = dma.hbm_to_vmem [thread:$0]  (!%p3774_p6), %s4442_s8, 16, %s580_s22, [#allocation18]  }
 0x151   : > { %s3308_s25 = scalar_lea.hbm %s4444_s10, 16 }
 0x152   : > { %p3309_p1 = scmp.ne.s32.totalorder %s4444_s10, %s3308_s25  ;;  %p3315_p12 = scmp.lt.u32.totalorder %s3308_s25, %s4444_s10 }
 0x154   : > { %p3311_p3 = pnand %p3309_p1, %p3790_p8 }
 0x156   : > { %p3312_p11 = pneg %p3311_p3 }
 0x158   : > { %p3317_p13 = pnand %p3315_p12, %p3312_p11 }
 0x15a   : > { %3320 = shalt.err (!%p3317_p13)
}
 0x15b   : > { %s3321_s21 = scalar_lea.vmem %s602_s17, 16  ;;  %s3328_s22 = scalar_lea.vmem %s602_s17, 32 }
 0x15c   : > { %p3322_p0 = scmp.ne.s32.totalorder %s602_s17, %s3321_s21  ;;  %p3329_p7 = scmp.lt.s32.totalorder %s602_s17, %s602_s17 }
 0x15d   : > { %p3330_p9 = scmp.lt.s32.totalorder %s3328_s22, %s3321_s21 }
 0x15e   : > { %p3324_p2 = pnand %p3322_p0, %p3790_p8 }
 0x15f   : > { %p3331_p5 = por %p3330_p9, %p3329_p7 }
 0x160   : > { %p3325_p4 = pneg %p3324_p2 }
 0x162   : > { %p3332_p10 = pnand %p3331_p5, %p3325_p4 }
 0x164   : > { %3335 = shalt.err (!%p3332_p10)
}
 0x165   : > { %2812 = dma.hbm_to_vmem [thread:$0]  (!%p3774_p6), %s4444_s10, 16, %s602_s17, [#allocation21]  }
 0x166   : > { %s3613_s27 = smov [#allocation25]   ;;  %s3614_s3 = smov [#allocation28]  }
 0x167   : > { %s625_s30 = sshll.u32 %s3613_s27, 4  ;;  %s649_s2 = sshll.u32 %s3614_s3, 4  ;;  %s626_s30 = int_to_ptr.vmem [resolvable:$true] %s625_s30  ;;  %s650_s2 = int_to_ptr.vmem [resolvable:$true] %s649_s2 }
 0x168   : > { %s3336_s1 = scalar_lea.hbm %s4446_s12, 16 }
 0x169   : > { %p3337_p1 = scmp.ne.s32.totalorder %s4446_s12, %s3336_s1  ;;  %p3343_p12 = scmp.lt.u32.totalorder %s3336_s1, %s4446_s12 }
 0x16b   : > { %p3339_p3 = pnand %p3337_p1, %p3790_p8 }
 0x16d   : > { %p3340_p11 = pneg %p3339_p3 }
 0x16f   : > { %p3345_p13 = pnand %p3343_p12, %p3340_p11 }
 0x171   : > { %3348 = shalt.err (!%p3345_p13)
}
 0x172   : > { %s3349_s17 = scalar_lea.vmem %s626_s30, 16  ;;  %s3356_s19 = scalar_lea.vmem %s626_s30, 32 }
 0x173   : > { %p3350_p0 = scmp.ne.s32.totalorder %s626_s30, %s3349_s17  ;;  %p3357_p7 = scmp.lt.s32.totalorder %s626_s30, %s626_s30 }
 0x174   : > { %p3358_p9 = scmp.lt.s32.totalorder %s3356_s19, %s3349_s17 }
 0x175   : > { %p3352_p2 = pnand %p3350_p0, %p3790_p8 }
 0x176   : > { %p3359_p5 = por %p3358_p9, %p3357_p7 }
 0x177   : > { %p3353_p4 = pneg %p3352_p2 }
 0x179   : > { %p3360_p10 = pnand %p3359_p5, %p3353_p4 }
 0x17b   : > { %3363 = shalt.err (!%p3360_p10)
}
 0x17c   : > { %2818 = dma.hbm_to_vmem [thread:$0]  (!%p3774_p6), %s4446_s12, 16, %s626_s30, [#allocation24]  }
 0x17d   : > { %s3364_s0 = scalar_lea.hbm %s4448_s14, 16 }
 0x17e   : > { %p3365_p1 = scmp.ne.s32.totalorder %s4448_s14, %s3364_s0  ;;  %p3371_p12 = scmp.lt.u32.totalorder %s3364_s0, %s4448_s14 }
 0x180   : > { %p3367_p3 = pnand %p3365_p1, %p3790_p8 }
 0x182   : > { %p3368_p11 = pneg %p3367_p3 }
 0x184   : > { %p3373_p13 = pnand %p3371_p12, %p3368_p11 }
 0x186   : > { %3376 = shalt.err (!%p3373_p13)
}
 0x187   : > { %s3377_s22 = scalar_lea.vmem %s650_s2, 16  ;;  %s3384_s30 = scalar_lea.vmem %s650_s2, 32 }
 0x188   : > { %p3378_p0 = scmp.ne.s32.totalorder %s650_s2, %s3377_s22  ;;  %p3385_p7 = scmp.lt.s32.totalorder %s650_s2, %s650_s2 }
 0x189   : > { %p3386_p9 = scmp.lt.s32.totalorder %s3384_s30, %s3377_s22 }
 0x18a   : > { %p3380_p2 = pnand %p3378_p0, %p3790_p8 }
 0x18b   : > { %p3387_p5 = por %p3386_p9, %p3385_p7 }
 0x18c   : > { %p3381_p4 = pneg %p3380_p2 }
 0x18e   : > { %p3388_p10 = pnand %p3387_p5, %p3381_p4 }
 0x190   : > { %3391 = shalt.err (!%p3388_p10)
}
 0x191   : > { %2824 = dma.hbm_to_vmem [thread:$0]  (!%p3774_p6), %s4448_s14, 16, %s650_s2, [#allocation27]  }
 0x192   : > { %s3615_s24 = smov [#allocation31]   ;;  %s3392_s0 = scalar_lea.hbm %s4450_s16, 16 }
 0x193   : > { %s671_s27 = sshll.u32 %s3615_s24, 4  ;;  %p3393_p1 = scmp.ne.s32.totalorder %s4450_s16, %s3392_s0  ;;  %s672_s27 = int_to_ptr.vmem [resolvable:$true] %s671_s27 }
 0x194   : > { %p3399_p12 = scmp.lt.u32.totalorder %s3392_s0, %s4450_s16 }
 0x195   : > { %p3395_p3 = pnand %p3393_p1, %p3790_p8 }
 0x197   : > { %p3396_p11 = pneg %p3395_p3 }
 0x199   : > { %p3401_p13 = pnand %p3399_p12, %p3396_p11 }
 0x19b   : > { %3404 = shalt.err (!%p3401_p13)
}
 0x19c   : > { %s3405_s2 = scalar_lea.vmem %s672_s27, 16  ;;  %s3412_s22 = scalar_lea.vmem %s672_s27, 32 }
 0x19d   : > { %p3406_p0 = scmp.ne.s32.totalorder %s672_s27, %s3405_s2  ;;  %p3413_p7 = scmp.lt.s32.totalorder %s672_s27, %s672_s27 }
 0x19e   : > { %p3414_p9 = scmp.lt.s32.totalorder %s3412_s22, %s3405_s2 }
 0x19f   : > { %p3408_p2 = pnand %p3406_p0, %p3790_p8 }
 0x1a0   : > { %p3415_p5 = por %p3414_p9, %p3413_p7 }
 0x1a1   : > { %p3409_p4 = pneg %p3408_p2 }
 0x1a3   : > { %p3416_p10 = pnand %p3415_p5, %p3409_p4 }
 0x1a5   : > { %3419 = shalt.err (!%p3416_p10)
}
 0x1a6   : > { %s4502_s19 = sld [smem:[#allocation51_spill]]  ;;  %s4503_s24 = sld [smem:[#allocation50_spill]] }
 0x1a7   : > { %s4504_s3 = sld [smem:[#allocation48_spill]]  ;;  %s4505_s25 = sld [smem:[#allocation47_spill]] }
 0x1a8   : > { %s4506_s20 = sld [smem:[#allocation46_spill]]  ;;  %s4507_s0 = sld [smem:[#allocation52_spill]] }
 0x1a9   : > { %2830 = dma.hbm_to_vmem [thread:$0]  (!%p3774_p6), %s4450_s16, 16, %s672_s27, [#allocation30]  }
 0x1aa   : > { %s4514_s4 = sld [smem:[#allocation54_spill]] }
 0x1ac   : > { %s2426_s1 = sadd.s32 4294967294, %s4502_s19   ;;  %s58_s29 = sadd.s32 1, %s4503_s24 }
 0x1ad   : > { %p60_p8 = scmp.ge.s32.totalorder %s58_s29, 2  ;;  %s65_s23 = sadd.s32 1, %s4504_s3 }
 0x1ae   : > { %p72_p1 = scmp.ne.s32.totalorder %s4504_s3, %s4505_s25  ;;  %p73_p3 = scmp.eq.s32.totalorder %s4502_s19, 0 }
 0x1af   : > { %s4539_s29 = smov (%p60_p8, %s58_s29), 0  ;;  %p78_p12 = scmp.ne.s32.totalorder %s4505_s25, %s4506_s20 }
 0x1b0   : > { %p4113_p11 = por %p73_p3, %p72_p1  ;;  %s62_s27 = ssub.s32 %s4503_s24, %s4539_s29 }
 0x1b1   : > { %s4509_s21 = sadd.s32 4294967295, %s4502_s19   ;;  %p63_p13 = scmp.eq.s32.totalorder %s62_s27, 0 }
 0x1b2   : > { %p440_p6 = scmp.eq.s32.totalorder %s4509_s21, 1  ;;  %p4510_p0 = scmp.ne.s32.totalorder %s4507_s0, 0 }
 0x1b3   : > { %p446_p7 = scmp.eq.s32.totalorder %s2426_s1, 1  ;;  %p2858_p5 = scmp.lt.s32.totalorder %s4502_s19, 2 }
 0x1b4   : > { %p4125_p2 = por %p4510_p0, %p78_p12  ;;  %p4129_p4 = por %p440_p6, %p72_p1 }
 0x1b5   : > { %s4134_s30 = scalar_select %p63_p13, %s4504_s3, %s65_s23  }
 0x1b6   : > { %s4512_s22 = scalar_select %p4129_p4, 1, 0 }
 0x1b7   : > { %p4136_p9 = por %p446_p7, %p78_p12  ;;  %s682_s25 = sand.u32 1, %s4504_s3  }
 0x1b8   : > { %s2446_s20 = sshll.u32 %s4503_s24, 7  ;;  %s2445_s27 = sshll.u32 %s682_s25, 3 }
 0x1b9   : > { %s4513_s17 = scalar_select %p4136_p9, 1, 0 }
 0x1ba   : > { %s4146_s5 = scalar_lea.hbm %s4514_s4, %s2446_s20  ;;  %s686_s1 = scalar_lea.vmem [#allocation5], %s2445_s27 }
 0x1bb   : > { %s693_s23 = sshll.u32 %s686_s1, 4  ;;  %p4150_p10 = pnand %p2858_p5, %p4113_p11  ;;  %s4154_s23 = int_to_ptr.vmem [resolvable:$true] %s693_s23 }
 0x1bc   : > { %s683_s19 = scalar_lea.sflag [#allocation6], %s682_s25  ;;  %s3420_s24 = scalar_lea.hbm %s4146_s5, 128 }
 0x1bd   : > { %p3421_p8 = scmp.ne.s32.totalorder %s4146_s5, %s3420_s24  ;;  %p3422_p1 = pneg %p4150_p10 }
 0x1be   : > { %s3425_s28 = scalar_lea.hbm %s4514_s4, 256  ;;  %p3426_p11 = scmp.lt.u32.totalorder %s4146_s5, %s4514_s4 }
 0x1bf   : > { %p3423_p3 = pnand %p3422_p1, %p3421_p8  ;;  %p3427_p6 = scmp.lt.u32.totalorder %s3425_s28, %s3420_s24 }
 0x1c0   : > { %p3429_p0 = scmp.lt.u32.totalorder %s3420_s24, %s4146_s5 }
 0x1c1   : > { %p3424_p12 = pneg %p3423_p3  ;;  %p3428_p13 = por %p3427_p6, %p3426_p11 }
 0x1c3   : > { %p3430_p7 = por %p3429_p0, %p3428_p13 }
 0x1c5   : > { %p3431_p5 = pnand %p3430_p7, %p3424_p12 }
 0x1c7   : > { %3434 = shalt.err (!%p3431_p5)
}
 0x1c8   : > { %s3435_s25 = scalar_lea.vmem %s4154_s23, 128  ;;  %s3616_s21 = smov [#allocation5]  }
 0x1c9   : > { %p3436_p8 = scmp.ne.s32.totalorder %s4154_s23, %s3435_s25  ;;  %s3440_s1 = sshll.u32 %s3616_s21, 4  ;;  %s3441_s1 = int_to_ptr.vmem [resolvable:$false] %s3440_s1 }
 0x1ca   : > { %s3442_s3 = scalar_lea.vmem %s3441_s1, 256  ;;  %p3443_p4 = scmp.lt.s32.totalorder %s4154_s23, %s3441_s1 }
 0x1cb   : > { %p3438_p3 = pnand %p3436_p8, %p3422_p1  ;;  %p3444_p11 = scmp.lt.s32.totalorder %s3442_s3, %s3435_s25 }
 0x1cd   : > { %p3439_p9 = pneg %p3438_p3  ;;  %p3445_p6 = por %p3444_p11, %p3443_p4 }
 0x1cf   : > { %p3446_p13 = pnand %p3445_p6, %p3439_p9 }
 0x1d1   : > { %3449 = shalt.err (!%p3446_p13)
}
 0x1d2   : > { %2834 = dma.hbm_to_vmem [thread:$0]  (!%p4150_p10), %s4146_s5, 128, %s4154_s23, %s683_s19  }
 0x1d3   : > { %s4516_s24 = sld [smem:[#allocation53_spill]] }
 0x1d9   : > { %p4517_p12 = scmp.ne.s32.totalorder %s4516_s24, 0 }
 0x1da   : > { %s4518_s20 = sld [smem:[#allocation47_spill]] (!%p4517_p12) }
 0x1db   : > { %702 = sbr.rel (%p4517_p12) target bundleno = 3023 (0xbcf), region = 88 }
 0x1e0   : > { %s4184_s28 = sand.u32 (!%p4517_p12), 1, %s4518_s20  }
 0x1e1   : > { %s4473_s27 = sshll.u32 (!%p4517_p12), %s4184_s28, 3  ;;  %s705_s0 = scalar_lea.sflag (!%p4517_p12), [#allocation6], %s4184_s28 }
 0x1e2   : > { %s4190_s25 = scalar_lea.vmem [#allocation5], %s4473_s27 }
 0x1e3   : > { %3531 = dma.done.wait (%p4125_p2), %s705_s0, 128  }
 0x1e4   : > { %3533 = vsyncadd (%p4125_p2), %s705_s0, 4294967168  ;;  %s4519_s5 = sld [smem:[#allocation52_spill]] }
 0x1ea   : > { %p4520_p4 = scmp.ne.s32.totalorder %s4519_s5, 0 }
 0x1ec   : > { %3535 = dma.done.wait (%p4520_p4), [#allocation9], 528  }
 0x1ed   : > { %3537 = vsyncadd (%p4520_p4), [#allocation9], 4294966768 }
 0x1ee   : > { %3539 = dma.done.wait (%p4520_p4), [#allocation12], 528  }
 0x1ef   : > { %3541 = vsyncadd (%p4520_p4), [#allocation12], 4294966768 }
 0x1f0   : > { %3543 = dma.done.wait (%p4520_p4), [#allocation15], 528  }
 0x1f1   : > { %3545 = vsyncadd (%p4520_p4), [#allocation15], 4294966768 }
 0x1f2   : > { %3547 = dma.done.wait (%p4520_p4), [#allocation18], 528  }
 0x1f3   : > { %3549 = vsyncadd (%p4520_p4), [#allocation18], 4294966768 }
 0x1f4   : > { %3551 = dma.done.wait (%p4520_p4), [#allocation21], 32  }
 0x1f5   : > { %3553 = vsyncadd (%p4520_p4), [#allocation21], 4294967264 }
 0x1f6   : > { %3555 = dma.done.wait (%p4520_p4), [#allocation24], 528  }
 0x1f7   : > { %3557 = vsyncadd (%p4520_p4), [#allocation24], 4294966768 }
 0x1f8   : > { %3559 = dma.done.wait (%p4520_p4), [#allocation27], 1040  }
 0x1f9   : > { %3561 = vsyncadd (%p4520_p4), [#allocation27], 4294966256 }
 0x1fa   : > { %3563 = dma.done.wait (%p4520_p4), [#allocation30], 32  }
 0x1fb   : > { %3565 = vsyncadd (%p4520_p4), [#allocation30], 4294967264  ;;  %v3617_v0 = vmov 0.0|0.0   ;;  %vm3618_vm0 = vmmov 0   ;;  %v3619_v1 = vmov 0.0   ;;  %v835_v2 = vld [vmem:[#allocation11] sm:$0xff] }
 0x1fc   : > { %2670 = vmatprep.subr.bf16.mxu1 %v3617_v0  ;;  %2564 = vmatprep.mubr.msk.f32.mxu1 %vm3618_vm0, %v3619_v1  ;;  %v836_v3 = vld [vmem:[#allocation11 + $0x8] sm:$0xff]  ;;  %v837_v4 = vld [vmem:[#allocation11 + $0x10] sm:$0xff]  ;;  %v838_v6 = vld [vmem:[#allocation11 + $0x18] sm:$0xff]  ;;  %vm846_vm1 = vcmask 261120   ;;  %vm1094_vm2 = vcmask 64512   ;;  %s3620_s6 = smov 112  }
 0x1fd   : > { %2682 = vmatprep.subr.bf16.mxu0 %v3617_v0  ;;  %2586 = vmatprep.mubr.msk.f32.mxu0 %vm3618_vm0, %v3619_v1  ;;  %v2671_v5 = vpack.c.bf16 %v836_v3, %v835_v2  ;;  %v1006_v7 = vld [vmem:[#allocation8] sm:$0xff]  ;;  %v1007_v8 = vld [vmem:[#allocation8 + $0x8] sm:$0xff]  ;;  %v1008_v9 = vld [vmem:[#allocation8 + $0x10] sm:$0xff]  ;;  %v2674_v11 = vpack.c.bf16 %v838_v6, %v837_v4  ;;  %s3621_s2 = smov 120   ;;  %s3622_s23 = smov 104   ;;  %vm1438_vm3 = vcmask 130112  }
 0x1fe   : > { %v1009_v10 = vld [vmem:[#allocation8 + $0x18] sm:$0xff]  ;;  %v2683_v12 = vpack.c.bf16 %v1007_v8, %v1006_v7  ;;  %v921_v13 = vld [vmem:[#allocation14] sm:$0xff]  ;;  %v922_v14 = vld [vmem:[#allocation14 + $0x8] sm:$0xff]  ;;  %s2466_s19 = sshll.u32 %s4184_s28, 5  ;;  %s3623_s1 = smov 8   ;;  %vm1618_vm4 = vcmask 195712  }
 0x1ff   : > { %2672 = vmatpush3.bf16.msra.mxu1 %v2671_v5  ;;  %v2686_v15 = vpack.c.bf16 %v1009_v10, %v1008_v9  ;;  %v4237_v16 = vld [vmem:[%s4190_s25] sm:$0xff]  ;;  %v2677_v17 = vpack.c.bf16 %v922_v14, %v921_v13  ;;  %v2467_v21 = vld [vmem:[#allocation13] ss:$0 sm:$0xff]  ;;  %v2471_v27 = vld [vmem:[#allocation10] ss:$0 sm:$0xff]  ;;  %s4302_s21 = scalar_lea.vmem [#allocation33], %s2466_s19 }
 0x200   : > { %2673 = vmatprep.subr.bf16.mxu1 %v3617_v0  ;;  %2684 = vmatpush3.bf16.msra.mxu0 %v2683_v12  ;;  %v923_v18 = vld [vmem:[#allocation14 + $0x10] sm:$0xff]  ;;  %v924_v19 = vld [vmem:[#allocation14 + $0x18] sm:$0xff]  ;;  %v2469_v31 = vld [vmem:[#allocation16] ss:$0 sm:$0xff]  ;;  %s3624_s3 = smov 16   ;;  %s3625_s24 = smov 24  }
 0x201   : > { %2685 = vmatprep.subr.bf16.mxu0 %v3617_v0  ;;  %v2680_v20 = vpack.c.bf16 %v924_v19, %v923_v18  ;;  %vm1798_vm5 = vcmask 261312   ;;  %vm2016_vm6 = vcmask 523264   ;;  %s4521_s20 = sld [smem:[#allocation49_spill]]  ;;  %s2155_s25 = sshll.u32 %s4302_s21, 4  ;;  %s4351_s25 = int_to_ptr.vmem [resolvable:$true] %s2155_s25 }
 0x202   : > { %p4523_p9 = scmp.ne.s32.totalorder %s4512_s22, 0 }
 0x203   : > { %2675 = vmatpush3.bf16.msra.mxu1 %v2674_v11 }
 0x204   : > { %2676 = vmatprep.subr.bf16.mxu1 %v3617_v0  ;;  %2687 = vmatpush3.bf16.msra.mxu0 %v2686_v15 }
 0x205   : > { %2599 = vmatprep.subr.mxu0 %v3619_v1 }
 0x206   : > { %2565 = vmatmul.mubr.msk.f32.vlgmr.msra.gmra.mrb[0].mxu1 %vm846_vm1, %v4237_v16 }
 0x207   : > { %2678 = vmatpush3.bf16.msra.mxu1 %v2677_v17  ;;  %2575 = vmatprep.mubr.msk.f32.mxu1 %vm3618_vm0, %v3619_v1  ;;  %s2505_s0 = sshll.u32 %s4521_s20, 9 }
 0x208   : > { %2587 = vmatmul.mubr.msk.f32.vlgmr.msra.gmra.mrb[0].mxu0 %vm846_vm1, %v4237_v16  ;;  %2679 = vmatprep.subr.bf16.mxu1 %v3617_v0 }
 0x209   : > { %2601 = vmatprep.mubr.msk.f32.mxu0 %vm3618_vm0, %v3619_v1 }
 0x20b   : > { %2681 = vmatpush3.bf16.msra.mxu1 %v2680_v20 }
 0x20c   : > { %2589 = vmatprep.subr.mxu1 %v3619_v1 }
 0x20e   : > { %2576 = vmatmul.mubr.msk.f32.vlgmr.msra.gmra.mrb[2].mxu1 %vm846_vm1, %v4237_v16 }
 0x20f   : > { %2591 = vmatprep.mubr.msk.f32.mxu1 %vm3618_vm0, %v3619_v1 }
 0x2d9   : > { %v916_v22 = vpop.f32.mrb[0].mxu1 }
 0x2da   : > { %v917_v23 = vadd.f32 %v2467_v21, %v916_v22  ;;  %v2566_v24 = vpop.f32.mrb[1].mxu1 }
 0x2db   : > { %v1087_v25 = vpop.f32.mrb[0].mxu0 }
 0x2dc   : > { %920 = vst.msk [vmem:[#allocation3] sm:$0xff] %vm846_vm1, %v917_v23  ;;  %v2588_v26 = vpop.f32.mrb[1].mxu0  ;;  %v1088_v28 = vadd.f32 %v2471_v27, %v1087_v25 }
 0x2de   : > { %v1091_v30 = vmul.f32 0.35355338, %v1088_v28 }
 0x2e1   : > { %v998_v32 = vpop.f32.mrb[2].mxu1 }
 0x2e2   : > { %v999_v33 = vadd.f32 %v2469_v31, %v998_v32  ;;  %v2577_v34 = vpop.f32.mrb[3].mxu1 }
 0x2e3   : > { %v1440_v29 = vld [vmem:[#allocation3] sm:$0xff] }
 0x2e4   : > { %1445 = vrot.lane.b32.xlu1 %v1440_v29, %s3620_s6  ;;  %1265 = vrot.lane.b32.xlu0 %v1440_v29, %s3621_s2  ;;  %1002 = vst.msk [vmem:[#allocation4] sm:$0xff] %vm846_vm1, %v999_v33 }
 0x2e5   : > { %2590 = vmatpush3.xpose.msk.msra.mxu1 %vm1094_vm2, %v1440_v29 }
 0x2e6   : > { %2594 = vmatprep.subr.mxu1 %v3619_v1 }
 0x2e8   : > { %2592 = vmatmul.mubr.msk.f32.vlgmr.msra.gmra.mrb[4].mxu1 %vm1094_vm2, %v1091_v30  ;;  %1442 = vrot.lane.b32.xlu1 %v1091_v30, %s3620_s6 }
 0x2e9   : > { %1262 = vrot.lane.b32.xlu0 %v1091_v30, %s3621_s2  ;;  %2596 = vmatprep.mubr.msk.f32.mxu1 %vm3618_vm0, %v3619_v1 }
 0x2eb   : > { %v4268_v35 = vld [vmem:[#allocation4] sm:$0xff] }
 0x2ec   : > { %1622 = vrot.lane.b32.xlu1 %v1091_v30, %s3622_s23  ;;  %2595 = vmatpush3.msra.mxu1 %v4268_v35 }
 0x2ed   : > { %1625 = vrot.lane.b32.xlu0 %v1440_v29, %s3622_s23  ;;  %2604 = vmatprep.subr.mxu1 %v3619_v1 }
 0x356   : > { %v1266_v36 = vpop.permute.xlu0 %1265  ;;  %v1446_v37 = vpop.permute.xlu1 %1445 }
 0x357   : > { %2600 = vmatpush3.xpose.msk.msra.mxu0 %vm1094_vm2, %v1266_v36 }
 0x358   : > { %2609 = vmatprep.subr.mxu0 %v3619_v1 }
 0x35a   : > { %v1443_v39 = vpop.permute.xlu1 %1442 }
 0x35b   : > { %v1263_v38 = vpop.permute.xlu0 %1262 }
 0x35c   : > { %2602 = vmatmul.mubr.msk.f32.vlgmr.msra.gmra.mrb[2].mxu0 %vm1094_vm2, %v1263_v38 }
 0x35d   : > { %2610 = vmatpush3.xpose.msk.msra.mxu0 %vm1094_vm2, %v1446_v37  ;;  %2611 = vmatprep.mubr.msk.f32.mxu0 %vm3618_vm0, %v3619_v1 }
 0x35e   : > { %2619 = vmatprep.subr.mxu0 %v3619_v1  ;;  %v1623_v41 = vpop.permute.xlu1 %1622 }
 0x35f   : > { %v1626_v40 = vpop.permute.xlu0 %1625 }
 0x360   : > { %2612 = vmatmul.mubr.msk.f32.vlgmr.msra.gmra.mrb[4].mxu0 %vm1094_vm2, %v1443_v39 }
 0x361   : > { %2620 = vmatpush3.xpose.msk.msra.mxu0 %vm1094_vm2, %v1626_v40  ;;  %2621 = vmatprep.mubr.msk.f32.mxu0 %vm3618_vm0, %v3619_v1 }
 0x362   : > { %2688 = vmatprep.subr.bf16.mxu0 %v3617_v0 }
 0x364   : > { %2622 = vmatmul.mubr.msk.f32.vlgmr.msra.gmra.mrb[6].mxu0 %vm1094_vm2, %v1623_v41 }
 0x365   : > { %2637 = vmatprep.mubr.msk.f32.mxu0 %vm3618_vm0, %v3619_v1 }
 0x3bb   : > { %v1167_v42 = vpop.f32.mrb[4].mxu1 }
 0x3bc   : > { %v2593_v43 = vpop.f32.mrb[5].mxu1  ;;  %v1171_v44 = vsel %vm1094_vm2, %v1167_v42, -inf }
 0x3bd   : > { %1172 = vmax.xlane.f32.xlu0 %v1171_v44  ;;  %v1802_v43 = vld [vmem:[#allocation17 + $0x8] sm:$0xff] }
 0x42f   : > { %v1337_v45 = vpop.f32.mrb[2].mxu0 }
 0x430   : > { %v2603_v46 = vpop.f32.mrb[3].mxu0  ;;  %v1341_v47 = vsel %vm1094_vm2, %v1337_v45, -inf }
 0x431   : > { %1342 = vmax.xlane.f32.xlu1 %v1341_v47  ;;  %v1804_v46 = vld [vmem:[#allocation17 + $0x18] sm:$0xff] }
 0x433   : > { %v1517_v48 = vpop.f32.mrb[4].mxu0 }
 0x434   : > { %v2613_v49 = vpop.f32.mrb[5].mxu0  ;;  %v1521_v50 = vsel %vm1094_vm2, %v1517_v48, -inf }
 0x435   : > { %1522 = vmax.xlane.f32.xlu0 %v1521_v50 }
 0x437   : > { %v1697_v51 = vpop.f32.mrb[6].mxu0 }
 0x438   : > { %v2623_v52 = vpop.f32.mrb[7].mxu0  ;;  %v1701_v53 = vsel %vm1094_vm2, %v1697_v51, -inf }
 0x439   : > { %1702 = vmax.xlane.f32.xlu0 %v1701_v53 }
 0x44a   : > { %v1173_v54 = vpop.xlane.xlu0 %1172 }
 0x44b   : > { %v1174_v55 = vsub.f32 %v1167_v42, %v1173_v54  ;;  %v1801_v42 = vld [vmem:[#allocation17] sm:$0xff] }
 0x44c   : > { %v2689_v44 = vpack.c.bf16 %v1802_v43, %v1801_v42 }
 0x44d   : > { %v1175_v56 = vmul.f32 1.442695, %v1174_v55 }
 0x44e   : > { %2690 = vmatpush3.bf16.msra.mxu0 %v2689_v44 }
 0x44f   : > { %2952 = vpow2.f32 %v1175_v56  ;;  %2691 = vmatprep.subr.bf16.mxu0 %v3617_v0 }
 0x459   : > { %v2953_v57 = vpop.eup %2952 }
 0x45a   : > { %v1177_v58 = vsel %vm1094_vm2, %v2953_v57, 0.0 }
 0x45b   : > { %1178 = vadd.xlane.f32.xlu1 %v1177_v58  ;;  %v2488_v58 = vld [vmem:[#allocation19] ss:$0 sm:$0xff] }
 0x46c   : > { %1358 = vrot.lane.b32.xlu1 %v4268_v35, %s3621_s2  ;;  %s4522_s2 = sld [smem:[#allocation62_spill]] }
 0x4be   : > { %v1343_v59 = vpop.xlane.xlu1 %1342 }
 0x4bf   : > { %v1344_v60 = vsub.f32 %v1337_v45, %v1343_v59  ;;  %v1803_v45 = vld [vmem:[#allocation17 + $0x10] sm:$0xff] }
 0x4c0   : > { %v2692_v47 = vpack.c.bf16 %v1804_v46, %v1803_v45 }
 0x4c1   : > { %v1345_v61 = vmul.f32 1.442695, %v1344_v60 }
 0x4c2   : > { %v1523_v62 = vpop.xlane.xlu0 %1522  ;;  %2693 = vmatpush3.bf16.msra.mxu0 %v2692_v47 }
 0x4c3   : > { %2954 = vpow2.f32 %v1345_v61  ;;  %v1524_v63 = vsub.f32 %v1517_v48, %v1523_v62  ;;  %2700 = vmatprep.subr.bf16.mxu0 %v3617_v0 }
 0x4c5   : > { %v1525_v2 = vmul.f32 1.442695, %v1524_v63 }
 0x4c6   : > { %v1703_v3 = vpop.xlane.xlu0 %1702 }
 0x4c7   : > { %2956 = vpow2.f32 %v1525_v2  ;;  %v1704_v4 = vsub.f32 %v1697_v51, %v1703_v3 }
 0x4c9   : > { %v1705_v5 = vmul.f32 1.442695, %v1704_v4 }
 0x4cb   : > { %2958 = vpow2.f32 %v1705_v5 }
 0x4cd   : > { %v2955_v6 = vpop.eup %2954 }
 0x4ce   : > { %v1347_v7 = vsel %vm1094_vm2, %v2955_v6, 0.0 }
 0x4cf   : > { %1348 = vadd.xlane.f32.xlu0 %v1347_v7  ;;  %v1916_v7 = vld [vmem:[#allocation23] sm:$0xff] }
 0x4d1   : > { %v2957_v8 = vpop.eup %2956 }
 0x4d2   : > { %v1527_v9 = vsel %vm1094_vm2, %v2957_v8, 0.0 }
 0x4d3   : > { %1528 = vadd.xlane.f32.xlu1 %v1527_v9 }
 0x4d5   : > { %v2959_v10 = vpop.eup %2958 }
 0x4d6   : > { %v1707_v11 = vsel %vm1094_vm2, %v2959_v10, 0.0 }
 0x4d7   : > { %1708 = vadd.xlane.f32.xlu0 %v1707_v11 }
 0x4e4   : > { %1718 = vrot.lane.b32.xlu1 %v4268_v35, %s3622_s23  ;;  %s4349_s23 = scalar_lea.hbm %s4522_s2, %s2505_s0 }
 0x4e8   : > { %v1179_v12 = vpop.xlane.xlu1 %1178 }
 0x4e9   : > { %2960 = vrcp.f32 %v1179_v12 }
 0x4ec   : > { %v1359_v19 = vpop.permute.xlu1 %1358 }
 0x4ed   : > { %1538 = vrot.lane.b32.xlu0 %v4268_v35, %s3620_s6 }
 0x4f3   : > { %v2961_v13 = vpop.eup %2960 }
 0x4f4   : > { %v1181_v14 = vmul.f32 %v2961_v13, %v1179_v12  ;;  %v2002_v12 = vld [vmem:[#allocation26 + $0x8] sm:$0xff] }
 0x4f6   : > { %v1182_v15 = vsub.f32 2.0, %v1181_v14 }
 0x4f8   : > { %v1183_v17 = vmul.f32 %v2961_v13, %v1182_v15  ;;  %v2003_v13 = vld [vmem:[#allocation26 + $0x10] sm:$0xff]  ;;  %v2004_v15 = vld [vmem:[#allocation26 + $0x18] sm:$0xff] }
 0x4fa   : > { %v1184_v18 = vmul.f32 %v2953_v57, %v1183_v17  ;;  %v2704_v17 = vpack.c.bf16 %v2004_v15, %v2003_v13 }
 0x4fc   : > { %1185 = vst.msk [vmem:[%s4302_s21] sm:$0xff] %vm1094_vm2, %v1184_v18  ;;  %2597 = vmatmul.mubr.msk.f32.vlgmr.msra.gmra.mrb[6].mxu1 %vm1094_vm2, %v1184_v18  ;;  %v2005_v18 = vld [vmem:[#allocation26 + $0x20] sm:$0xff] }
 0x4fd   : > { %2605 = vmatpush3.msra.mxu1 %v1359_v19  ;;  %2606 = vmatprep.mubr.msk.f32.mxu1 %vm3618_vm0, %v3619_v1  ;;  %v2006_v19 = vld [vmem:[#allocation26 + $0x28] sm:$0xff] }
 0x4fe   : > { %2614 = vmatprep.subr.mxu1 %v3619_v1 }
 0x55c   : > { %v1349_v20 = vpop.xlane.xlu0 %1348 }
 0x55d   : > { %2962 = vrcp.f32 %v1349_v20 }
 0x560   : > { %v1529_v21 = vpop.xlane.xlu1 %1528 }
 0x561   : > { %2964 = vrcp.f32 %v1529_v21 }
 0x564   : > { %v1709_v22 = vpop.xlane.xlu0 %1708  ;;  %v1719_v37 = vpop.permute.xlu1 %1718 }
 0x565   : > { %2966 = vrcp.f32 %v1709_v22 }
 0x567   : > { %v2963_v23 = vpop.eup %2962 }
 0x568   : > { %v1351_v24 = vmul.f32 %v2963_v23, %v1349_v20  ;;  %v1539_v34 = vpop.permute.xlu0 %1538  ;;  %v2707_v20 = vpack.c.bf16 %v2006_v19, %v2005_v18 }
 0x56a   : > { %v1352_v25 = vsub.f32 2.0, %v1351_v24 }
 0x56b   : > { %v2965_v26 = vpop.eup %2964 }
 0x56c   : > { %v1353_v27 = vmul.f32 %v2963_v23, %v1352_v25  ;;  %v1531_v28 = vmul.f32 %v2965_v26, %v1529_v21  ;;  %v2490_v25 = vld [vmem:[#allocation20] ss:$0 sm:$0xff] }
 0x56e   : > { %v1354_v29 = vmul.f32 %v2955_v6, %v1353_v27  ;;  %v1532_v30 = vsub.f32 2.0, %v1531_v28  ;;  %v2491_v27 = vld [vmem:[#allocation22] ss:$0 sm:$0xff] }
 0x56f   : > { %v2967_v31 = vpop.eup %2966 }
 0x570   : > { %2478 = vst.msk [vmem:[%s4302_s21 + $0x8] sm:$0xff] %vm1094_vm2, %v1354_v29  ;;  %v1533_v32 = vmul.f32 %v2965_v26, %v1532_v30  ;;  %v1711_v33 = vmul.f32 %v2967_v31, %v1709_v22  ;;  %2607 = vmatmul.mubr.msk.f32.vlgmr.msra.gmra.mrb[8].mxu1 %vm1094_vm2, %v1354_v29  ;;  %v2007_v30 = vld [vmem:[#allocation26 + $0x30] sm:$0xff] }
 0x571   : > { %2615 = vmatpush3.msra.mxu1 %v1539_v34  ;;  %2616 = vmatprep.mubr.msk.f32.mxu1 %vm3618_vm0, %v3619_v1 }
 0x572   : > { %v1534_v35 = vmul.f32 %v2957_v8, %v1533_v32  ;;  %v1712_v36 = vsub.f32 2.0, %v1711_v33  ;;  %2624 = vmatprep.subr.mxu1 %v3619_v1  ;;  %v1917_v8 = vld [vmem:[#allocation23 + $0x8] sm:$0xff]  ;;  %v2492_v33 = vld [vmem:[#allocation25] ss:$0 sm:$0xff] }
 0x573   : > { %v2695_v9 = vpack.c.bf16 %v1917_v8, %v1916_v7 }
 0x574   : > { %2482 = vst.msk [vmem:[%s4302_s21 + $0x10] sm:$0xff] %vm1094_vm2, %v1534_v35  ;;  %v1713_v38 = vmul.f32 %v2967_v31, %v1712_v36  ;;  %2617 = vmatmul.mubr.msk.f32.vlgmr.msra.gmra.mrb[10].mxu1 %vm1094_vm2, %v1534_v35  ;;  %v2008_v31 = vld [vmem:[#allocation26 + $0x38] sm:$0xff] }
 0x575   : > { %2625 = vmatpush3.msra.mxu1 %v1719_v37  ;;  %2626 = vmatprep.mubr.msk.f32.mxu1 %vm3618_vm0, %v3619_v1  ;;  %v2710_v32 = vpack.c.bf16 %v2008_v31, %v2007_v30  ;;  %v2494_v37 = vld [vmem:[#allocation28] ss:$0 sm:$0xff] }
 0x576   : > { %v1714_v39 = vmul.f32 %v2959_v10, %v1713_v38  ;;  %2694 = vmatprep.subr.bf16.mxu1 %v3617_v0  ;;  %v1919_v10 = vld [vmem:[#allocation23 + $0x18] sm:$0xff] }
 0x578   : > { %2486 = vst.msk [vmem:[%s4302_s21 + $0x18] sm:$0xff] %vm1094_vm2, %v1714_v39  ;;  %2627 = vmatmul.mubr.msk.f32.vlgmr.msra.gmra.mrb[12].mxu1 %vm1094_vm2, %v1714_v39 }
 0x579   : > { %2648 = vmatprep.mubr.msk.f32.mxu1 %vm3618_vm0, %v3619_v1  ;;  %2696 = vmatpush3.bf16.msra.mxu1 %v2695_v9 }
 0x57a   : > { %2697 = vmatprep.subr.bf16.mxu1 %v3617_v0 }
 0x5cf   : > { %v1255_v40 = vpop.f32.mrb[6].mxu1 }
 0x5d0   : > { %1259 = vst.msk [vmem:[#allocation2] sm:$0xff] %vm1094_vm2, %v1255_v40  ;;  %v2598_v41 = vpop.f32.mrb[7].mxu1 }
 0x643   : > { %v1430_v48 = vpop.f32.mrb[8].mxu1 }
 0x644   : > { %1435 = vrot.lane.b32.xlu1 %v1430_v48, %s3623_s1  ;;  %v2608_v49 = vpop.f32.mrb[9].mxu1 }
 0x647   : > { %v1610_v50 = vpop.f32.mrb[10].mxu1 }
 0x648   : > { %1615 = vrot.lane.b32.xlu0 %v1610_v50, %s3624_s3  ;;  %v2618_v51 = vpop.f32.mrb[11].mxu1  ;;  %s3450_s3 = scalar_lea.vmem %s4351_s25, 512 }
 0x649   : > { %p3451_p2 = scmp.ne.s32.totalorder %s4351_s25, %s3450_s3 }
 0x64b   : > { %v1790_v52 = vpop.f32.mrb[12].mxu1  ;;  %p3452_p10 = pnand %p3451_p2, %p4523_p9 }
 0x64c   : > { %1795 = vrot.lane.b32.xlu1 %v1790_v52, %s3625_s24  ;;  %v2628_v53 = vpop.f32.mrb[13].mxu1  ;;  %s3626_s24 = smov [#allocation33]  }
 0x64d   : > { %p3453_p1 = pneg %p3452_p10  ;;  %s3454_s27 = sshll.u32 %s3626_s24, 4  ;;  %s3455_s27 = int_to_ptr.vmem [resolvable:$false] %s3454_s27 }
 0x64e   : > { %s3456_s21 = scalar_lea.vmem %s3455_s27, 1024  ;;  %p3457_p0 = scmp.lt.s32.totalorder %s4351_s25, %s3455_s27 }
 0x64f   : > { %p3458_p7 = scmp.lt.s32.totalorder %s3456_s21, %s3450_s3 }
 0x651   : > { %p3459_p5 = por %p3458_p7, %p3457_p0 }
 0x653   : > { %p3460_p8 = pnand %p3459_p5, %p3453_p1 }
 0x6b6   : > { %v1436_v54 = vpop.permute.xlu1 %1435 }
 0x6b7   : > { %1439 = vst.msk [vmem:[#allocation2] sm:$0xff] %vm1438_vm3, %v1436_v54 }
 0x6ba   : > { %v1616_v55 = vpop.permute.xlu0 %1615 }
 0x6bb   : > { %1619 = vst.msk [vmem:[#allocation2] sm:$0xff] %vm1618_vm4, %v1616_v55 }
 0x6be   : > { %v1796_v56 = vpop.permute.xlu1 %1795 }
 0x6bf   : > { %1799 = vst.msk [vmem:[#allocation2] sm:$0xff] %vm1798_vm5, %v1796_v56 }
 0x6c6   : > { %v1800_v57 = vld [vmem:[#allocation2] sm:$0xff] }
 0x6c7   : > { %2638 = vmatmul.mubr.msk.f32.vlgmr.msra.gmra.mrb[8].mxu0 %vm846_vm1, %v1800_v57 }
 0x6c8   : > { %2667 = vmatprep.mubr.msk.f32.mxu0 %vm3618_vm0, %v3619_v1  ;;  %v1918_v1 = vld [vmem:[#allocation23 + $0x10] sm:$0xff] }
 0x6c9   : > { %v2698_v11 = vpack.c.bf16 %v1919_v10, %v1918_v1 }
 0x6cb   : > { %2699 = vmatpush3.bf16.msra.mxu1 %v2698_v11 }
 0x79a   : > { %v1881_v59 = vpop.f32.mrb[8].mxu0 }
 0x79b   : > { %v1882_v60 = vadd.f32 %v2488_v58, %v1881_v59  ;;  %v2639_v61 = vpop.f32.mrb[9].mxu0 }
 0x79d   : > { %v1885_v62 = vadd.f32 %v1882_v60, %v4237_v16  ;;  %v2001_v16 = vld [vmem:[#allocation26] sm:$0xff] }
 0x79e   : > { %v2701_v14 = vpack.c.bf16 %v2002_v12, %v2001_v16 }
 0x79f   : > { %v1886_v63 = vsel %vm846_vm1, %v1885_v62, 0.0 }
 0x7a0   : > { %1887 = vadd.xlane.f32.xlu0 %v1886_v63  ;;  %2702 = vmatpush3.bf16.msra.mxu0 %v2701_v14 }
 0x7a1   : > { %2703 = vmatprep.subr.bf16.mxu0 %v3617_v0 }
 0x7a4   : > { %2705 = vmatpush3.bf16.msra.mxu0 %v2704_v17 }
 0x7a5   : > { %2706 = vmatprep.subr.bf16.mxu0 %v3617_v0 }
 0x7a8   : > { %2708 = vmatpush3.bf16.msra.mxu0 %v2707_v20 }
 0x7a9   : > { %2709 = vmatprep.subr.bf16.mxu0 %v3617_v0 }
 0x7ac   : > { %2711 = vmatpush3.bf16.msra.mxu0 %v2710_v32 }
 0x82d   : > { %v1888_v2 = vpop.xlane.xlu0 %1887 }
 0x82e   : > { %v1890_v3 = vmul.f32 0.03125, %v1888_v2 }
 0x830   : > { %v1891_v4 = vsub.f32 %v1885_v62, %v1890_v3 }
 0x832   : > { %v1892_v5 = vmul.f32 %v1891_v4, %v1891_v4 }
 0x834   : > { %v1893_v6 = vsel %vm846_vm1, %v1892_v5, 0.0 }
 0x835   : > { %1894 = vadd.xlane.f32.xlu1 %v1893_v6 }
 0x8c2   : > { %v1895_v21 = vpop.xlane.xlu1 %1894 }
 0x8c3   : > { %v1896_v22 = vmul.f32 0.03125, %v1895_v21 }
 0x8c5   : > { %v1897_v23 = vadd.f32 1e-05, %v1896_v22 }
 0x8c7   : > { %2968 = vrsqrt.f32 %v1897_v23 }
 0x8d1   : > { %v2969_v24 = vpop.eup %2968 }
 0x8d2   : > { %v1899_v26 = vmul.f32 %v2969_v24, %v1891_v4 }
 0x8d4   : > { %v1907_v28 = vmul.f32 %v2490_v25, %v1899_v26 }
 0x8d6   : > { %v1915_v29 = vadd.f32 %v2491_v27, %v1907_v28 }
 0x8d8   : > { %2649 = vmatmul.mubr.msk.f32.vlgmr.msra.gmra.mrb[14].mxu1 %vm846_vm1, %v1915_v29 }
 0x9ab   : > { %v1996_v34 = vpop.f32.mrb[14].mxu1 }
 0x9ac   : > { %v1997_v35 = vadd.f32 %v2492_v33, %v1996_v34  ;;  %v2650_v0 = vpop.f32.mrb[15].mxu1 }
 0x9ae   : > { %v2000_v36 = vmax.f32 %v1997_v35, 0.0 }
 0x9b0   : > { %2668 = vmatmul.mubr.msk.f32.vlgmr.msra.gmra.mrb[10].mxu0 %vm2016_vm6, %v2000_v36 }
 0xa83   : > { %v2086_v38 = vpop.f32.mrb[10].mxu0 }
 0xa84   : > { %v2087_v39 = vadd.f32 %v2494_v37, %v2086_v38  ;;  %v2669_v40 = vpop.f32.mrb[11].mxu0 }
 0xa86   : > { %v2090_v41 = vadd.f32 %v2087_v39, %v1915_v29 }
 0xa88   : > { %v2091_v42 = vsel %vm846_vm1, %v2090_v41, 0.0 }
 0xa89   : > { %2092 = vadd.xlane.f32.xlu0 %v2091_v42 }
 0xb16   : > { %v2093_v43 = vpop.xlane.xlu0 %2092 }
 0xb17   : > { %v2094_v44 = vmul.f32 0.03125, %v2093_v43 }
 0xb19   : > { %v2095_v45 = vsub.f32 %v2090_v41, %v2094_v44 }
 0xb1b   : > { %v2096_v46 = vmul.f32 %v2095_v45, %v2095_v45 }
 0xb1d   : > { %v2097_v47 = vsel %vm846_vm1, %v2096_v46, 0.0 }
 0xb1e   : > { %2098 = vadd.xlane.f32.xlu0 %v2097_v47 }
 0xb1f   : > { %3463 = shalt.err (!%p3460_p8)
}
 0xb20   : > { %s3464_s0 = scalar_lea.hbm %s4349_s23, 512  ;;  %s3468_s24 = scalar_lea.hbm %s4522_s2, 1024 }
 0xb21   : > { %p3465_p3 = scmp.ne.s32.totalorder %s4349_s23, %s3464_s0  ;;  %p3469_p13 = scmp.lt.u32.totalorder %s4349_s23, %s4522_s2 }
 0xb22   : > { %p3470_p12 = scmp.lt.u32.totalorder %s3468_s24, %s3464_s0  ;;  %p3472_p2 = scmp.lt.u32.totalorder %s3464_s0, %s4349_s23 }
 0xb23   : > { %p3466_p11 = pnand %p3465_p3, %p4523_p9 }
 0xb24   : > { %p3471_p4 = por %p3470_p12, %p3469_p13 }
 0xb25   : > { %p3467_p6 = pneg %p3466_p11 }
 0xb26   : > { %p3473_p10 = por %p3472_p2, %p3471_p4 }
 0xb28   : > { %p3474_p1 = pnand %p3473_p10, %p3467_p6 }
 0xb2a   : > { %3477 = shalt.err (!%p3474_p1)
}
 0xb2b   : > { %s3627_s3 = smov 128   ;;  %s4524_s21 = scalar_lea.sflag [#allocation34], %s4184_s28  ;;  %v2496_v52 = vld [vmem:[#allocation29] ss:$0 sm:$0xff]  ;;  %v2497_v54 = vld [vmem:[#allocation31] ss:$0 sm:$0xff] }
 0xb2c   : > { %2779 = dma.vmem_to_hbm [thread:$0]  (%p4523_p9), %s4351_s25, 512, %s4349_s23, %s4524_s21, %s3627_s3, %s3627_s3, %s3623_s1  }
 0xb2d   : > { %s2500_s19 = sshll.u32 %s4521_s20, 7  ;;  %s4525_s0 = sshll.u32 %s4184_s28, 3 }
 0xb2e   : > { %s822_s5 = scalar_lea.vmem [#allocation32], %s4525_s0  ;;  %s4526_s2 = sld [smem:[#allocation61_spill]] }
 0xb2f   : > { %s2141_s6 = sshll.u32 %s822_s5, 4  ;;  %s2122_s25 = scalar_lea.sflag [#allocation7], %s4184_s28  ;;  %s4386_s6 = int_to_ptr.vmem [resolvable:$true] %s2141_s6 }
 0xb30   : > { %s3478_s23 = scalar_lea.vmem %s4386_s6, 128  ;;  %s3628_s20 = smov [#allocation32]  }
 0xb31   : > { %p3479_p0 = scmp.ne.s32.totalorder %s4386_s6, %s3478_s23  ;;  %s3482_s3 = sshll.u32 %s3628_s20, 4  ;;  %s3483_s3 = int_to_ptr.vmem [resolvable:$false] %s3482_s3 }
 0xb32   : > { %s3484_s21 = scalar_lea.vmem %s3483_s3, 256  ;;  %p3485_p8 = scmp.lt.s32.totalorder %s4386_s6, %s3483_s3 }
 0xb33   : > { %p3480_p7 = pnand %p3479_p0, %p4523_p9  ;;  %p3486_p3 = scmp.lt.s32.totalorder %s3484_s21, %s3478_s23 }
 0xb34   : > { %s4384_s1 = scalar_lea.hbm %s4526_s2, %s2500_s19 }
 0xb35   : > { %p3481_p5 = pneg %p3480_p7  ;;  %p3487_p11 = por %p3486_p3, %p3485_p8 }
 0xb37   : > { %p3488_p6 = pnand %p3487_p11, %p3481_p5 }
 0xbab   : > { %v2099_v48 = vpop.xlane.xlu0 %2098 }
 0xbac   : > { %v2100_v49 = vmul.f32 0.03125, %v2099_v48 }
 0xbae   : > { %v2101_v50 = vadd.f32 1e-05, %v2100_v49 }
 0xbb0   : > { %2970 = vrsqrt.f32 %v2101_v50 }
 0xbba   : > { %v2971_v51 = vpop.eup %2970 }
 0xbbb   : > { %v2103_v53 = vmul.f32 %v2971_v51, %v2095_v45 }
 0xbbd   : > { %v2111_v55 = vmul.f32 %v2496_v52, %v2103_v53 }
 0xbbf   : > { %v2119_v56 = vadd.f32 %v2497_v54, %v2111_v55 }
 0xbc1   : > { %2120 = vst.msk [vmem:[%s822_s5] sm:$0xff] %vm846_vm1, %v2119_v56 }
 0xbc2   : > { %3491 = shalt.err (!%p3488_p6)
}
 0xbc3   : > { %s3492_s28 = scalar_lea.hbm %s4384_s1, 128  ;;  %s3496_s5 = scalar_lea.hbm %s4526_s2, 256 }
 0xbc4   : > { %p3493_p13 = scmp.ne.s32.totalorder %s4384_s1, %s3492_s28  ;;  %p3497_p2 = scmp.lt.u32.totalorder %s4384_s1, %s4526_s2 }
 0xbc5   : > { %p3498_p10 = scmp.lt.u32.totalorder %s3496_s5, %s3492_s28  ;;  %p3500_p0 = scmp.lt.u32.totalorder %s3492_s28, %s4384_s1 }
 0xbc6   : > { %p3494_p12 = pnand %p3493_p13, %p4523_p9 }
 0xbc7   : > { %p3499_p1 = por %p3498_p10, %p3497_p2 }
 0xbc8   : > { %p3495_p4 = pneg %p3494_p12 }
 0xbc9   : > { %p3501_p7 = por %p3500_p0, %p3499_p1 }
 0xbcb   : > { %p3502_p5 = pnand %p3501_p7, %p3495_p4 }
 0xbcd   : > { %3505 = shalt.err (!%p3502_p5)
}
 0xbce   : > { %2778 = dma.vmem_to_hbm [thread:$0]  (%p4523_p9), %s4386_s6, 128, %s4384_s1, %s2122_s25  }
 0xbcf PF: > { %s4527_s23 = sld [smem:[#allocation46_spill]]  ;;  %s4528_s20 = sld [smem:[#allocation51_spill]] }
 0xbd0   : > { %p4529_p8 = scmp.ne.s32.totalorder %s4513_s17, 0 }
 0xbd5   : > { %s2170_s3 = sand.u32 1, %s4527_s23   ;;  %p4530_p3 = scmp.ge.s32.totalorder %s4528_s20, 2 }
 0xbd6   : > { %s2171_s21 = scalar_lea.sflag [#allocation7], %s2170_s3 }
 0xbd7   : > { %p2836_p11 = pnand %p4530_p3, %p4529_p8 }
 0xbd9   : > { %3567 = dma.done.wait (!%p2836_p11), %s2171_s21, 128  }
 0xbda   : > { %3569 = vsyncadd (!%p2836_p11), %s2171_s21, 4294967168  ;;  %s2180_s28 = scalar_lea.sflag [#allocation34], %s2170_s3 }
 0xbdb   : > { %3571 = dma.done.wait (!%p2836_p11), %s2180_s28, 512  }
 0xbdc   : > { %3573 = vsyncadd (!%p2836_p11), %s2180_s28, 4294966784  ;;  %s46_s19 = sadd.s32 1, %s4528_s20   ;;  %s4531_s27 = sld [smem:[#allocation47_spill]] }
 0xbdd   : > { %p43_p6 = scmp.ge.s32.totalorder %s46_s19, 4   ;;  %s4532_s28 = sld [smem:[#allocation48_spill]] }
 0xbde   : > { %s4533_s22 = sld [smem:[#allocation50_spill]]  ;;  %s4534_s6 = smov %s4539_s29 }
 0xbdf   : > { %s4535_s29 = smov %s4134_s30  ;;  %s4537_s0 = smov %s4534_s6 }
 0xbe0   :  { %45 = sbr.rel (!%p43_p6) target bundleno = 26 (0x1a), region = 222 }
 0xbe4   : > { %s4536_s30 = smov %s4533_s22 }
 0xbe7   :  { %2185 = vsyncpa [#allocation6], 1 }
 0xbe8   :  { %2187 = vsyncpa [#allocation6 + $0x1], 1 }
 0xbe9   :  { %2188 = vsyncpa [#allocation9], 1 }
 0xbea   :  { %2189 = vsyncpa [#allocation12], 1 }
 0xbeb   :  { %2190 = vsyncpa [#allocation15], 1 }
 0xbec   :  { %2191 = vsyncpa [#allocation18], 1 }
 0xbed   :  { %2192 = vsyncpa [#allocation21], 1 }
 0xbee   :  { %2193 = vsyncpa [#allocation24], 1 }
 0xbef   :  { %2194 = vsyncpa [#allocation27], 1 }
 0xbf0   :  { %2195 = vsyncpa [#allocation30], 1 }
 0xbf1   :  { %2196 = vsyncpa [#allocation7], 1 }
 0xbf2   :  { %2198 = vsyncpa [#allocation7 + $0x1], 1 }
 0xbf3   :  { %2199 = vsyncpa [#allocation34], 1 }
 0xbf4   :  { %2201 = vsyncpa [#allocation34 + $0x1], 1 }

</bundles_post_ra>
